<compile_context>
chip_gen: v7x
topology: tpu7x:2x2x1
jax: 0.10.0
libtpu: 0.0.40
codegen_flags: <defaults>
</compile_context>

<pallas_src>
import functools

import jax
import jax.numpy as jnp
import numpy as np
from jax.experimental import pallas as pl
from jax.experimental.pallas import tpu as pltpu

C4, C5, DET_H = 128, 256, 65     # convPa: 128->256 (3x3), convPb: 256->65 (1x1)
DET_PAD = 128                    # output channels padded to a full lane width
BN_EPS = 1e-5


def dethead_kernel(xcat_ref, w1_ref, s1_ref, b1_ref, w2_ref, s2_ref, b2_ref,
                   o_ref, *, RB, MC, W):
    """One (batch, row-block) tile per grid step.

    xcat_ref : (1, (H+2)*W, 3*C4) bf16   dx-concatenated padded NHWC input
    w1_ref   : (3, 3*C4, C5)      bf16   conv3x3 weights, dy-major, dx folded into K
    s1_ref   : (1, C5)            f32    BN1 scale (gamma / sqrt(var+eps))
    b1_ref   : (1, C5)            f32    folded bias (conv1 bias + BN1 shift)
    w2_ref   : (C5, DET_PAD)      bf16   conv1x1 weights, zero-padded cols
    s2_ref   : (1, DET_PAD)       f32    BN2 scale (zero-padded)
    b2_ref   : (1, DET_PAD)       f32    folded bias (zero-padded)
    o_ref    : (1, RB, DET_PAD)   bf16   output row block (lane-dense, 128-wide)
    """
    rb0 = pl.program_id(1) * RB            # first output row of this grid tile

    def chunk(c, carry):
        out_row = pl.multiple_of(c * MC, MC)
        in_row = pl.multiple_of(rb0 + c * MC, MC)

        # --- conv3x3 (pad=1): 3 dy-grouped K=384 MXU dots; dy reduction stays
        # in a register-resident f32 accumulator (no VMEM round-trips). ---
        acc = jnp.dot(xcat_ref[0, pl.ds(in_row, MC), :], w1_ref[0],
                      preferred_element_type=jnp.float32)
        acc = acc + jnp.dot(xcat_ref[0, pl.ds(in_row + W, MC), :], w1_ref[1],
                            preferred_element_type=jnp.float32)
        acc = acc + jnp.dot(xcat_ref[0, pl.ds(in_row + 2 * W, MC), :], w1_ref[2],
                            preferred_element_type=jnp.float32)

        # --- BN1 (eval) + folded bias + ReLU in f32, bf16 for the 2nd MXU pass ---
        h = jnp.maximum(acc * s1_ref[...] + b1_ref[...], 0.0).astype(jnp.bfloat16)

        # --- conv1x1 + BN2 (eval): lane-dense 128-wide bf16 store ---
        y = jnp.dot(h, w2_ref[...], preferred_element_type=jnp.float32)
        o_ref[0, pl.ds(out_row, MC), :] = (
            y * s2_ref[...] + b2_ref[...]).astype(o_ref.dtype)
        return carry

    jax.lax.fori_loop(0, RB // MC, chunk, 0)


def _largest_divisor_leq(n, cap, align=1):
    best = 0
    for d in range(align, min(cap, n) + 1, align):
        if n % d == 0:
            best = d
    return best


def _const_spec(shape):
    # Constant-index weight/bias blocks: single-buffered (no redundant per-step
    # staging, frees the extra pipeline buffer VMEM).
    ndim = len(shape)
    return pl.BlockSpec(shape, lambda *_: (0,) * ndim,
                        pipeline_mode=pl.Buffered(1))


def dethead_forward(x_nchw, params):
    N, C, H, W = x_nchw.shape
    assert C == C4
    HW = H * W

    # NHWC bf16 + spatial pad, then dx-concatenate in the wrapper (XLA-side
    # layout plumbing; ~3x HBM read of a small input is negligible and frees the
    # kernel's vector-load/store and XLU slots).
    x_nhwc = jnp.transpose(x_nchw, (0, 2, 3, 1)).astype(jnp.bfloat16)
    x_pad = jnp.pad(x_nhwc, ((0, 0), (1, 1), (1, 1), (0, 0)))
    xcat = jnp.concatenate([x_pad[:, :, dx:dx + W, :] for dx in range(3)], axis=-1)
    xcat = xcat.reshape(N, (H + 2) * W, 3 * C4)

    # Row-block grid tile over the flattened H*W output rows (>=2 blocks when
    # possible so the pipeline / v7x megacore have work to overlap), and a 64-row
    # inner M-chunk so the f32 accumulator stays register resident (~16 vregs).
    rb_cap = min(512, max(8, HW // 2))
    RB = _largest_divisor_leq(HW, rb_cap, align=8) or HW
    MC = _largest_divisor_leq(RB, 64, align=8) or RB
    n_rb = HW // RB

    out = pl.pallas_call(
        functools.partial(dethead_kernel, RB=RB, MC=MC, W=W),
        out_shape=jax.ShapeDtypeStruct((N, HW, DET_PAD), jnp.bfloat16),
        grid_spec=pltpu.PrefetchScalarGridSpec(
            num_scalar_prefetch=0,
            grid=(N, n_rb),
            in_specs=[
                pl.BlockSpec((1, (H + 2) * W, 3 * C4), lambda n, r: (n, 0, 0)),
                _const_spec((3, 3 * C4, C5)),
                _const_spec((1, C5)),
                _const_spec((1, C5)),
                _const_spec((C5, DET_PAD)),
                _const_spec((1, DET_PAD)),
                _const_spec((1, DET_PAD)),
            ],
            out_specs=pl.BlockSpec((1, RB, DET_PAD), lambda n, r: (n, r, 0)),
        ),
        compiler_params=pltpu.CompilerParams(
            dimension_semantics=("parallel", "parallel")),
    )(xcat, params["w1"], params["s1"], params["b1"],
      params["w2"], params["s2"], params["b2"])

    semi = out[..., :DET_H].astype(jnp.float32).reshape(N, H, W, DET_H)
    return jnp.transpose(semi, (0, 3, 1, 2))                          # NCHW


def make_params(key):
    """Deterministic parameter init matching the PyTorch module's shapes."""
    ks = jax.random.split(key, 12)
    # convPa: Conv2d(128, 256, 3, pad=1) -> weight (O, I, 3, 3), bias (O,)
    w1_oihw = jax.random.normal(ks[0], (C5, C4, 3, 3), jnp.float32) * 0.05
    cb1 = jax.random.normal(ks[1], (C5,), jnp.float32) * 0.05
    # bnPa: BatchNorm2d(256)
    g1 = 1.0 + 0.1 * jax.random.normal(ks[2], (C5,), jnp.float32)
    be1 = 0.1 * jax.random.normal(ks[3], (C5,), jnp.float32)
    m1 = 0.1 * jax.random.normal(ks[4], (C5,), jnp.float32)
    v1 = jax.random.uniform(ks[5], (C5,), jnp.float32, 0.5, 1.5)
    # convPb: Conv2d(256, 65, 1) -> weight (O, I, 1, 1), bias (O,)
    w2_oihw = jax.random.normal(ks[6], (DET_H, C5, 1, 1), jnp.float32) * 0.05
    cb2 = jax.random.normal(ks[7], (DET_H,), jnp.float32) * 0.05
    # bnPb: BatchNorm2d(65)
    g2 = 1.0 + 0.1 * jax.random.normal(ks[8], (DET_H,), jnp.float32)
    be2 = 0.1 * jax.random.normal(ks[9], (DET_H,), jnp.float32)
    m2 = 0.1 * jax.random.normal(ks[10], (DET_H,), jnp.float32)
    v2 = jax.random.uniform(ks[11], (DET_H,), jnp.float32, 0.5, 1.5)

    # Eval-mode BN: per-channel scale applied in the f32 epilogue (NOT folded
    # into the bf16 weights); conv bias + BN shift folded into one f32 bias.
    s1 = g1 / jnp.sqrt(v1 + BN_EPS)
    b1 = be1 + s1 * (cb1 - m1)
    s2 = g2 / jnp.sqrt(v2 + BN_EPS)
    b2 = be2 + s2 * (cb2 - m2)

    # Kernel-friendly layouts: dy-major / dx-folded-into-K conv1 weights, and
    # lane-padded (65 -> 128) conv2 weights / scales / biases.
    w1_cat = jnp.transpose(w1_oihw, (2, 3, 1, 0)).reshape(3, 3 * C4, C5)
    w2_mat = jnp.transpose(w2_oihw[:, :, 0, 0], (1, 0))               # (C5, 65)
    w2_pad = jnp.zeros((C5, DET_PAD), jnp.float32).at[:, :DET_H].set(w2_mat)
    s2_pad = jnp.zeros((DET_PAD,), jnp.float32).at[:DET_H].set(s2)
    b2_pad = jnp.zeros((DET_PAD,), jnp.float32).at[:DET_H].set(b2)

    return {
        "w1": w1_cat.astype(jnp.bfloat16),
        "s1": s1.reshape(1, C5).astype(jnp.float32),
        "b1": b1.reshape(1, C5).astype(jnp.float32),
        "w2": w2_pad.astype(jnp.bfloat16),
        "s2": s2_pad.reshape(1, DET_PAD).astype(jnp.float32),
        "b2": b2_pad.reshape(1, DET_PAD).astype(jnp.float32),
        # original layouts (for the pure-JAX f32 reference)
        "w1_oihw": w1_oihw, "cb1": cb1, "g1": g1, "be1": be1, "m1": m1, "v1": v1,
        "w2_oihw": w2_oihw, "cb2": cb2, "g2": g2, "be2": be2, "m2": m2, "v2": v2,
    }


def ref_forward(x_nchw, p):
    """Pure-JAX f32 reference (NCHW, like PyTorch, eval-mode BN)."""
    def bn(x, g, b, m, v):
        return (g[None, :, None, None] * (x - m[None, :, None, None])
                / jnp.sqrt(v + BN_EPS)[None, :, None, None]
                + b[None, :, None, None])

    y = jax.lax.conv_general_dilated(
        x_nchw, p["w1_oihw"], (1, 1), ((1, 1), (1, 1)),
        dimension_numbers=("NCHW", "OIHW", "NCHW"))
    y = y + p["cb1"][None, :, None, None]
    y = jnp.maximum(bn(y, p["g1"], p["be1"], p["m1"], p["v1"]), 0.0)
    z = jax.lax.conv_general_dilated(
        y, p["w2_oihw"], (1, 1), ((0, 0), (0, 0)),
        dimension_numbers=("NCHW", "OIHW", "NCHW"))
    z = z + p["cb2"][None, :, None, None]
    return bn(z, p["g2"], p["be2"], p["m2"], p["v2"])


if __name__ == "__main__":
    key = jax.random.PRNGKey(0)
    k_x, k_p = jax.random.split(key)

    N, H, W = 2, 16, 16
    x = jax.random.normal(k_x, (N, C4, H, W), jnp.float32)   # x4: (2, 128, 16, 16)
    params = make_params(k_p)

    semi = jax.block_until_ready(dethead_forward(x, params))
    assert semi.shape == (N, DET_H, H, W), semi.shape

    semi_ref = jax.block_until_ready(ref_forward(x, params))
    # bf16 activations/weights/output (f32 MXU accumulation, f32 BN epilogue)
    # => looser tolerance vs. the f32 reference.
    np.testing.assert_allclose(np.asarray(semi), np.asarray(semi_ref),
                               rtol=5e-2, atol=5e-2)

    print("KERNEL_OK")
</pallas_src>

<mosaic_0001>
module attributes {stable_mosaic.version = 11 : i64} {
  func.func @dethead_kernel(%arg0: i32, %arg1: i32, %arg2: memref<1x288x384xbf16, #tpu.memory_space<vmem>>, %arg3: memref<3x384x256xbf16, #tpu.memory_space<vmem>>, %arg4: memref<1x256xf32, #tpu.memory_space<vmem>>, %arg5: memref<1x256xf32, #tpu.memory_space<vmem>>, %arg6: memref<256x128xbf16, #tpu.memory_space<vmem>>, %arg7: memref<1x128xf32, #tpu.memory_space<vmem>>, %arg8: memref<1x128xf32, #tpu.memory_space<vmem>>, %arg9: memref<1x128x128xbf16, #tpu.memory_space<vmem>>) attributes {dimension_semantics = [#tpu.dimension_semantics<parallel>, #tpu.dimension_semantics<parallel>], iteration_bounds = array<i64: 2, 2>, scalar_prefetch = 0 : i64, scratch_operands = 0 : i64, tpu.core_type = #tpu.core_type<tc>, window_params = [{transform_indices = @transform_0, window_bounds = array<i64: 1, 288, 384>}, {pipeline_mode = #tpu.pipeline_mode<synchronous>, transform_indices = @transform_1, window_bounds = array<i64: 3, 384, 256>}, {pipeline_mode = #tpu.pipeline_mode<synchronous>, transform_indices = @transform_2, window_bounds = array<i64: 1, 256>}, {pipeline_mode = #tpu.pipeline_mode<synchronous>, transform_indices = @transform_3, window_bounds = array<i64: 1, 256>}, {pipeline_mode = #tpu.pipeline_mode<synchronous>, transform_indices = @transform_4, window_bounds = array<i64: 256, 128>}, {pipeline_mode = #tpu.pipeline_mode<synchronous>, transform_indices = @transform_5, window_bounds = array<i64: 1, 128>}, {pipeline_mode = #tpu.pipeline_mode<synchronous>, transform_indices = @transform_6, window_bounds = array<i64: 1, 128>}, {transform_indices = @transform_7, window_bounds = array<i64: 1, 128, 128>}]} {
    %c128_i32 = arith.constant 128 : i32
    %0 = arith.muli %arg1, %c128_i32 : i32
    %c0_i32 = arith.constant 0 : i32
    %c2_i32 = arith.constant 2 : i32
    %1 = arith.addi %c0_i32, %c2_i32 : i32
    %c1_i32 = arith.constant 1 : i32
    scf.for %arg10 = %c0_i32 to %1 step %c1_i32  : i32 {
      %c64_i32 = arith.constant 64 : i32
      %2 = arith.muli %arg10, %c64_i32 : i32
      %3 = tpu.assume_multiple %2, 64 : i32
      %c64_i32_1 = arith.constant 64 : i32
      %4 = arith.muli %arg10, %c64_i32_1 : i32
      %5 = arith.addi %0, %4 : i32
      %6 = tpu.assume_multiple %5, 64 : i32
      %c0 = arith.constant 0 : index
      %7 = arith.index_cast %6 : i32 to index
      %c0_2 = arith.constant 0 : index
      %8 = vector.load %arg2[%c0, %7, %c0_2] : memref<1x288x384xbf16, #tpu.memory_space<vmem>>, vector<1x64x384xbf16>
      %9 = vector.shape_cast %8 : vector<1x64x384xbf16> to vector<64x384xbf16>
      %c0_3 = arith.constant 0 : index
      %c0_4 = arith.constant 0 : index
      %c0_5 = arith.constant 0 : index
      %10 = vector.load %arg3[%c0_3, %c0_4, %c0_5] : memref<3x384x256xbf16, #tpu.memory_space<vmem>>, vector<1x384x256xbf16>
      %11 = vector.shape_cast %10 : vector<1x384x256xbf16> to vector<384x256xbf16>
      %cst = arith.constant dense<0.000000e+00> : vector<64x256xf32>
      %12 = tpu.matmul %9, %11, %cst {dimension_numbers = #tpu.dot_dimension_numbers<[1], [0], [0], [1], [0, 0, 1, 1], [], []>} : vector<64x384xbf16>, vector<384x256xbf16>, vector<64x256xf32> -> vector<64x256xf32>
      %c16_i32 = arith.constant 16 : i32
      %13 = arith.addi %6, %c16_i32 : i32
      %c0_6 = arith.constant 0 : index
      %14 = arith.index_cast %13 : i32 to index
      %c0_7 = arith.constant 0 : index
      %15 = vector.load %arg2[%c0_6, %14, %c0_7] : memref<1x288x384xbf16, #tpu.memory_space<vmem>>, vector<1x64x384xbf16>
      %16 = vector.shape_cast %15 : vector<1x64x384xbf16> to vector<64x384xbf16>
      %c1 = arith.constant 1 : index
      %c0_8 = arith.constant 0 : index
      %c0_9 = arith.constant 0 : index
      %17 = vector.load %arg3[%c1, %c0_8, %c0_9] : memref<3x384x256xbf16, #tpu.memory_space<vmem>>, vector<1x384x256xbf16>
      %18 = vector.shape_cast %17 : vector<1x384x256xbf16> to vector<384x256xbf16>
      %cst_10 = arith.constant dense<0.000000e+00> : vector<64x256xf32>
      %19 = tpu.matmul %16, %18, %cst_10 {dimension_numbers = #tpu.dot_dimension_numbers<[1], [0], [0], [1], [0, 0, 1, 1], [], []>} : vector<64x384xbf16>, vector<384x256xbf16>, vector<64x256xf32> -> vector<64x256xf32>
      %20 = arith.addf %12, %19 : vector<64x256xf32>
      %c32_i32 = arith.constant 32 : i32
      %21 = arith.addi %6, %c32_i32 : i32
      %c0_11 = arith.constant 0 : index
      %22 = arith.index_cast %21 : i32 to index
      %c0_12 = arith.constant 0 : index
      %23 = vector.load %arg2[%c0_11, %22, %c0_12] : memref<1x288x384xbf16, #tpu.memory_space<vmem>>, vector<1x64x384xbf16>
      %24 = vector.shape_cast %23 : vector<1x64x384xbf16> to vector<64x384xbf16>
      %c2 = arith.constant 2 : index
      %c0_13 = arith.constant 0 : index
      %c0_14 = arith.constant 0 : index
      %25 = vector.load %arg3[%c2, %c0_13, %c0_14] : memref<3x384x256xbf16, #tpu.memory_space<vmem>>, vector<1x384x256xbf16>
      %26 = vector.shape_cast %25 : vector<1x384x256xbf16> to vector<384x256xbf16>
      %cst_15 = arith.constant dense<0.000000e+00> : vector<64x256xf32>
      %27 = tpu.matmul %24, %26, %cst_15 {dimension_numbers = #tpu.dot_dimension_numbers<[1], [0], [0], [1], [0, 0, 1, 1], [], []>} : vector<64x384xbf16>, vector<384x256xbf16>, vector<64x256xf32> -> vector<64x256xf32>
      %28 = arith.addf %20, %27 : vector<64x256xf32>
      %c0_16 = arith.constant 0 : index
      %c0_17 = arith.constant 0 : index
      %29 = vector.load %arg4[%c0_16, %c0_17] : memref<1x256xf32, #tpu.memory_space<vmem>>, vector<1x256xf32>
      %30 = vector.broadcast %29 : vector<1x256xf32> to vector<64x256xf32>
      %31 = arith.mulf %28, %30 : vector<64x256xf32>
      %c0_18 = arith.constant 0 : index
      %c0_19 = arith.constant 0 : index
      %32 = vector.load %arg5[%c0_18, %c0_19] : memref<1x256xf32, #tpu.memory_space<vmem>>, vector<1x256xf32>
      %33 = vector.broadcast %32 : vector<1x256xf32> to vector<64x256xf32>
      %34 = arith.addf %31, %33 : vector<64x256xf32>
      %cst_20 = arith.constant 0.000000e+00 : f32
      %35 = vector.broadcast %cst_20 : f32 to vector<64x256xf32>
      %36 = arith.maximumf %34, %35 : vector<64x256xf32>
      %37 = arith.truncf %36 : vector<64x256xf32> to vector<64x256xbf16>
      %c0_21 = arith.constant 0 : index
      %c0_22 = arith.constant 0 : index
      %38 = vector.load %arg6[%c0_21, %c0_22] : memref<256x128xbf16, #tpu.memory_space<vmem>>, vector<256x128xbf16>
      %cst_23 = arith.constant dense<0.000000e+00> : vector<64x128xf32>
      %39 = tpu.matmul %37, %38, %cst_23 {dimension_numbers = #tpu.dot_dimension_numbers<[1], [0], [0], [1], [0, 0, 1, 1], [], []>} : vector<64x256xbf16>, vector<256x128xbf16>, vector<64x128xf32> -> vector<64x128xf32>
      %c0_24 = arith.constant 0 : index
      %c0_25 = arith.constant 0 : index
      %40 = vector.load %arg7[%c0_24, %c0_25] : memref<1x128xf32, #tpu.memory_space<vmem>>, vector<1x128xf32>
      %41 = vector.broadcast %40 : vector<1x128xf32> to vector<64x128xf32>
      %42 = arith.mulf %39, %41 : vector<64x128xf32>
      %c0_26 = arith.constant 0 : index
      %c0_27 = arith.constant 0 : index
      %43 = vector.load %arg8[%c0_26, %c0_27] : memref<1x128xf32, #tpu.memory_space<vmem>>, vector<1x128xf32>
      %44 = vector.broadcast %43 : vector<1x128xf32> to vector<64x128xf32>
      %45 = arith.addf %42, %44 : vector<64x128xf32>
      %46 = arith.truncf %45 : vector<64x128xf32> to vector<64x128xbf16>
      %c0_28 = arith.constant 0 : index
      %47 = arith.index_cast %3 : i32 to index
      %c0_29 = arith.constant 0 : index
      %48 = vector.load %arg9[%c0_28, %47, %c0_29] : memref<1x128x128xbf16, #tpu.memory_space<vmem>>, vector<1x64x128xbf16>
      %49 = vector.shape_cast %48 : vector<1x64x128xbf16> to vector<64x128xbf16>
      %50 = vector.shape_cast %46 : vector<64x128xbf16> to vector<1x64x128xbf16>
      tpu.vector_store %arg9[%c0_28, %47, %c0_29], %50 {strides = array<i32>} : memref<1x128x128xbf16, #tpu.memory_space<vmem>>, vector<1x64x128xbf16>,
    }
    %c2_i32_0 = arith.constant 2 : i32
    return
  }
  func.func @transform_0(%arg0: i32, %arg1: i32) -> (i32, i32, i32) {
    %c0_i32 = arith.constant 0 : i32
    %c0_i32_0 = arith.constant 0 : i32
    %c0_i32_1 = arith.constant 0 : i32
    return %arg0, %c0_i32, %c0_i32_0 : i32, i32, i32
  }
  func.func @transform_1(%arg0: i32, %arg1: i32) -> (i32, i32, i32) {
    %c0_i32 = arith.constant 0 : i32
    %c0_i32_0 = arith.constant 0 : i32
    %c0_i32_1 = arith.constant 0 : i32
    %c0_i32_2 = arith.constant 0 : i32
    return %c0_i32, %c0_i32_0, %c0_i32_1 : i32, i32, i32
  }
  func.func @transform_2(%arg0: i32, %arg1: i32) -> (i32, i32) {
    %c0_i32 = arith.constant 0 : i32
    %c0_i32_0 = arith.constant 0 : i32
    %c0_i32_1 = arith.constant 0 : i32
    return %c0_i32, %c0_i32_0 : i32, i32
  }
  func.func @transform_3(%arg0: i32, %arg1: i32) -> (i32, i32) {
    %c0_i32 = arith.constant 0 : i32
    %c0_i32_0 = arith.constant 0 : i32
    %c0_i32_1 = arith.constant 0 : i32
    return %c0_i32, %c0_i32_0 : i32, i32
  }
  func.func @transform_4(%arg0: i32, %arg1: i32) -> (i32, i32) {
    %c0_i32 = arith.constant 0 : i32
    %c0_i32_0 = arith.constant 0 : i32
    %c0_i32_1 = arith.constant 0 : i32
    return %c0_i32, %c0_i32_0 : i32, i32
  }
  func.func @transform_5(%arg0: i32, %arg1: i32) -> (i32, i32) {
    %c0_i32 = arith.constant 0 : i32
    %c0_i32_0 = arith.constant 0 : i32
    %c0_i32_1 = arith.constant 0 : i32
    return %c0_i32, %c0_i32_0 : i32, i32
  }
  func.func @transform_6(%arg0: i32, %arg1: i32) -> (i32, i32) {
    %c0_i32 = arith.constant 0 : i32
    %c0_i32_0 = arith.constant 0 : i32
    %c0_i32_1 = arith.constant 0 : i32
    return %c0_i32, %c0_i32_0 : i32, i32
  }
  func.func @transform_7(%arg0: i32, %arg1: i32) -> (i32, i32, i32) {
    %c0_i32 = arith.constant 0 : i32
    %c0_i32_0 = arith.constant 0 : i32
    return %arg0, %arg1, %c0_i32 : i32, i32, i32
  }
}

</mosaic_0001>

<bundles_post_ra>
// kernel: tpu_custom_call.1
= control target key start
LH: loop header
LB: loop body
LE: loop exit
PB: predicated region body
PF: predicated region fallthrough
CT: control target
= control target key end

     0   :  { %s3961_s0 = inlined_call_operand.hbm [shape: bf16[2,288,384], index: 0, kind: input, shape index: {}]   ;;  %s3962_s1 = inlined_call_operand.hbm [shape: bf16[3,384,256], index: 1, kind: input, shape index: {}]   ;;  %s3963_s2 = inlined_call_operand.vmem [shape: f32[1,256], index: 2, kind: input, shape index: {}]   ;;  %s3964_s3 = inlined_call_operand.vmem [shape: f32[1,256], index: 3, kind: input, shape index: {}]   ;;  %s3965_s4 = inlined_call_operand.hbm [shape: bf16[256,128], index: 4, kind: input, shape index: {}]   ;;  %s3966_s5 = inlined_call_operand.vmem [shape: f32[1,128], index: 5, kind: input, shape index: {}]   ;;  %s3967_s6 = inlined_call_operand.vmem [shape: f32[1,128], index: 6, kind: input, shape index: {}]   ;;  %s3968_s7 = inlined_call_operand.hbm [shape: bf16[2,256,128], index: 7, kind: output, shape index: {}]  }
   0x1   :  { %3981 = sst [smem:[#allocation18_spill]] %s3962_s1 }
   0x2   :  { %3982 = sst [smem:[#allocation19_spill]] %s3965_s4 }
   0x3   :  { %3983 = sst [smem:[#allocation20_spill]] %s3967_s6 }
   0x4   :  { %3984 = sst [smem:[#allocation21_spill]] %s3968_s7 }
   0x5   :  { %12 = vsyncpa [#allocation3], 0 }
   0x6   :  { %14 = vsyncpa [#allocation3 + $0x1], 0 }
   0x7   :  { %15 = vsyncpa [#allocation6], 0 }
   0x8   :  { %16 = vsyncpa [#allocation4], 0 }
   0x9   :  { %18 = vsyncpa [#allocation4 + $0x1], 0  ;;  %s3491_s24 = smov 0   ;;  %s3493_s25 = smov 0  }
   0xa   :  { %s3495_s26 = smov 0   ;;  %s3497_s27 = smov 0  }
   0xb   :  { %s3499_s28 = smov 0   ;;  %s3501_s29 = smov 0  }
   0xc   :  { %s3503_s30 = smov 0   ;;  %s3505_s8 = smov 0  }
   0xd   :  { %s3507_s9 = smov 0   ;;  %s3509_s10 = smov 0  }
   0xe   :  { %s3511_s11 = smov 0  }
   0xf LB: > { %3985 = sst [smem:[#allocation12_spill]] %s3392_s24  ;;  %s2410_s12 = sadd.s32 4294967295, %s3432_s11   ;;  %s3432_s11 = sphi %s3511_s11, %s24_s11   ;;  %s3428_s10 = sphi %s3509_s10, %s4022_s10   ;;  %s3424_s9 = sphi %s3507_s9, %s4014_s9   ;;  %s3420_s8 = sphi %s3505_s8, %s4021_s8   ;;  %s3416_s30 = sphi %s3503_s30, %s4013_s30   ;;  %s3412_s29 = sphi %s3501_s29, %s4020_s29   ;;  %s3408_s28 = sphi %s3499_s28, %s4019_s28   ;;  %s3404_s27 = sphi %s3497_s27, %s4018_s27   ;;  %s3400_s26 = sphi %s3495_s26, %s4017_s26   ;;  %s3396_s25 = sphi %s3493_s25, %s4016_s25   ;;  %s3392_s24 = sphi %s3491_s24, %s4015_s24  }
  0x10   : > { %3986 = sst [smem:[#allocation13_spill]] %s3420_s8  ;;  %s2411_s13 = sadd.s32 4294967294, %s3432_s11  }
  0x11   : > { %3987 = sst [smem:[#allocation14_spill]] %s3424_s9  ;;  %p56_p0 = scmp.ne.s32.totalorder %s3408_s28, %s3404_s27 }
  0x12   : > { %p3547_p1 = scmp.eq.s32.totalorder %s2410_s12, 0  ;;  %p207_p2 = scmp.ne.s32.totalorder %s3400_s26, %s3396_s25 }
  0x13   : > { %p208_p4 = scmp.eq.s32.totalorder %s2410_s12, 3  ;;  %p213_p5 = scmp.ne.s32.totalorder %s3396_s25, %s3392_s24 }
  0x14   : > { %s3988_s14 = scalar_select %p3547_p1, 1, 0 }
  0x15   : > { %p3556_p3 = por %p3547_p1, %p56_p0  ;;  %p214_p6 = scmp.eq.s32.totalorder %s2411_s13, 3 }
  0x16   : > { %p3562_p7 = por %p208_p4, %p207_p2  ;;  %p2412_p8 = scmp.ge.s32.totalorder %s3432_s11, 1 }
  0x17   : > { %s3989_s16 = scalar_select %p3556_p3, 1, 0 }
  0x18   : > { %s3990_s17 = scalar_select %p3562_p7, 1, 0 }
  0x19   : > { %p3567_p9 = por %p214_p6, %p213_p5  ;;  %p221_p10 = scmp.lt.s32.totalorder %s3432_s11, 5 }
  0x1a   : > { %3991 = sst [smem:[#allocation15_spill]] %s3990_s17  ;;  %s3438_s20 = smov [#allocation5]  }
  0x1b   : > { %s3992_s18 = scalar_select %p3567_p9, 1, 0 }
  0x1c   : > { %p3572_p11 = pnand %p2412_p8, %p221_p10  ;;  %s233_s21 = sshll.u32 %s3438_s20, 4  ;;  %s234_s21 = int_to_ptr.vmem [resolvable:$true] %s233_s21 }
  0x1d   : > { %3993 = sst [smem:[#allocation16_spill]] %s3992_s18  ;;  %s3439_s23 = smov [#allocation7]  }
  0x1e   : > { %s3994_s19 = scalar_select %p3572_p11, 1, 0 }
  0x1f   : > { %p2808_p12 = pneg %p3572_p11  ;;  %s252_s27 = sshll.u32 %s3439_s23, 4  ;;  %s3584_s27 = int_to_ptr.vmem [resolvable:$true] %s252_s27 }
  0x20   : > { %s3996_s1 = sld [smem:[#allocation18_spill]] }
  0x21   : > { %p3580_p13 = pnand %p2808_p12, %p3547_p1 }
  0x23   : > { %p3218_p2 = pneg %p3580_p13 }
  0x26   : > { %s3216_s15 = scalar_lea.hbm %s3996_s1, 18432 }
  0x27   : > { %p3217_p0 = scmp.ne.s32.totalorder %s3996_s1, %s3216_s15  ;;  %p3223_p6 = scmp.lt.u32.totalorder %s3216_s15, %s3996_s1 }
  0x29   : > { %p3219_p4 = pnand %p3218_p2, %p3217_p0 }
  0x2b   : > { %p3220_p5 = pneg %p3219_p4 }
  0x2d   : > { %p3225_p8 = pnand %p3223_p6, %p3220_p5 }
  0x2f   : > { %3228 = shalt.err (!%p3225_p8)
}
  0x30   : > { %s3229_s23 = scalar_lea.vmem %s234_s21, 18432  ;;  %p3237_p7 = scmp.lt.s32.totalorder %s234_s21, %s234_s21 }
  0x31   : > { %p3230_p10 = scmp.ne.s32.totalorder %s234_s21, %s3229_s23  ;;  %p3238_p1 = scmp.lt.s32.totalorder %s3229_s23, %s3229_s23 }
  0x33   : > { %p3232_p12 = pnand %p3230_p10, %p3218_p2  ;;  %p3239_p3 = por %p3238_p1, %p3237_p7 }
  0x35   : > { %p3233_p9 = pneg %p3232_p12 }
  0x37   : > { %p3240_p11 = pnand %p3239_p3, %p3233_p9 }
  0x39   : > { %3243 = shalt.err (!%p3240_p11)
}
  0x3a   : > { %s3440_s18 = smov 128   ;;  %s3441_s12 = smov 8  }
  0x3b   : > { %2811 = dma.hbm_to_vmem [thread:$0]  (!%p3580_p13), %s3996_s1, 18432, %s234_s21, [#allocation6], %s3440_s18, %s3440_s18, %s3441_s12  }
  0x3c   : > { %s3997_s4 = sld [smem:[#allocation19_spill]] }
  0x42   : > { %s3244_s20 = scalar_lea.hbm %s3997_s4, 2048 }
  0x43   : > { %p3245_p0 = scmp.ne.s32.totalorder %s3997_s4, %s3244_s20  ;;  %p3251_p7 = scmp.lt.u32.totalorder %s3244_s20, %s3997_s4 }
  0x45   : > { %p3247_p1 = pnand %p3245_p0, %p3218_p2 }
  0x47   : > { %p3248_p3 = pneg %p3247_p1 }
  0x49   : > { %p3253_p9 = pnand %p3251_p7, %p3248_p3 }
  0x4b   : > { %3256 = shalt.err (!%p3253_p9)
}
  0x4c   : > { %s3257_s21 = scalar_lea.vmem %s3584_s27, 2048  ;;  %p3265_p6 = scmp.lt.s32.totalorder %s3584_s27, %s3584_s27 }
  0x4d   : > { %p3258_p11 = scmp.ne.s32.totalorder %s3584_s27, %s3257_s21  ;;  %p3266_p8 = scmp.lt.s32.totalorder %s3257_s21, %s3257_s21 }
  0x4f   : > { %p3260_p4 = pnand %p3258_p11, %p3218_p2  ;;  %p3267_p10 = por %p3266_p8, %p3265_p6 }
  0x51   : > { %p3261_p5 = pneg %p3260_p4 }
  0x53   : > { %p3268_p12 = pnand %p3267_p10, %p3261_p5 }
  0x55   : > { %3271 = shalt.err (!%p3268_p12)
}
  0x56   : > { %s3442_s6 = smov 64   ;;  %s3443_s8 = smov 4  }
  0x57   : > { %2814 = dma.hbm_to_vmem [thread:$0]  (!%p3580_p13), %s3997_s4, 2048, %s3584_s27, [#allocation6], %s3442_s6, %s3442_s6, %s3443_s8  }
  0x58   : > { %s33_s12 = sadd.s32 1, %s3424_s9  ;;  %s36_s7 = sadd.s32 1, %s3428_s10 }
  0x59   : > { %p34_p2 = scmp.ge.s32.totalorder %s33_s12, 2  ;;  %s43_s24 = sadd.s32 1, %s3412_s29 }
  0x5a   : > { %p50_p0 = scmp.ne.s32.totalorder %s3412_s29, %s3408_s28  ;;  %p51_p1 = scmp.eq.s32.totalorder %s3432_s11, 0 }
  0x5b   : > { %s4024_s12 = smov (%p34_p2, %s33_s12), 0  ;;  %s4026_s7 = smov (!%p34_p2, %s36_s7), %s3428_s10 }
  0x5c   : > { %3998 = sst [smem:[#allocation17_spill]] %s4024_s12  ;;  %p3642_p3 = por %p51_p1, %p50_p0 }
  0x5d   : > { %s193_s15 = ssub.s32 %s3424_s9, %s4024_s12  ;;  %p38_p13 = scmp.ge.s32.totalorder %s4026_s7, 2 }
  0x5e   : > { %p2825_p7 = scmp.lt.s32.totalorder %s3432_s11, 4  ;;  %s272_s27 = sand.u32 1, %s3412_s29  }
  0x5f   : > { %s2794_s13 = smul.u32 6912, %s3428_s10  ;;  %s4028_s7 = smov (%p38_p13, %s4026_s7), 0 }
  0x60   : > { %s2793_s20 = smul.u32 432, %s272_s27  ;;  %s40_s23 = ssub.s32 %s3428_s10, %s4028_s7 }
  0x61   : > { %s3658_s8 = scalar_lea.hbm %s3961_s0, %s2794_s13  ;;  %p41_p9 = scmp.eq.s32.totalorder %s40_s23, 0 }
  0x62   : > { %s194_s17 = sor.u32 %s193_s15, %s40_s23  ;;  %s4000_s1 = sadd.s32 1, %s3400_s26 }
  0x63   : > { %p195_p11 = scmp.eq.s32.totalorder %s194_s17, 0  ;;  %s276_s12 = scalar_lea.vmem [#allocation2], %s2793_s20 }
  0x64   : > { %s3661_s18 = scalar_select %p41_p9, %s3412_s29, %s43_s24  }
  0x65   : > { %s3666_s4 = scalar_select %p195_p11, %s3400_s26, %s4000_s1  }
  0x66   : > { %s283_s9 = sshll.u32 %s276_s12, 4  ;;  %p3672_p4 = pnand %p2825_p7, %p3642_p3  ;;  %s3676_s9 = int_to_ptr.vmem [resolvable:$true] %s283_s9 }
  0x67   : > { %s3678_s15 = scalar_lea.sflag [#allocation3], %s272_s27  ;;  %s3272_s24 = scalar_lea.hbm %s3658_s8, 6912 }
  0x68   : > { %p3273_p5 = scmp.ne.s32.totalorder %s3658_s8, %s3272_s24  ;;  %p3274_p6 = pneg %p3672_p4 }
  0x69   : > { %s3277_s22 = scalar_lea.hbm %s3961_s0, 13824  ;;  %p3278_p12 = scmp.lt.u32.totalorder %s3658_s8, %s3961_s0 }
  0x6a   : > { %p3275_p8 = pnand %p3274_p6, %p3273_p5  ;;  %p3279_p2 = scmp.lt.u32.totalorder %s3277_s22, %s3272_s24 }
  0x6b   : > { %p3281_p1 = scmp.lt.u32.totalorder %s3272_s24, %s3658_s8 }
  0x6c   : > { %p3276_p10 = pneg %p3275_p8  ;;  %p3280_p0 = por %p3279_p2, %p3278_p12 }
  0x6e   : > { %p3282_p3 = por %p3281_p1, %p3280_p0 }
  0x70   : > { %p3283_p13 = pnand %p3282_p3, %p3276_p10 }
  0x72   : > { %3286 = shalt.err (!%p3283_p13)
}
  0x73   : > { %s3287_s27 = scalar_lea.vmem %s3676_s9, 6912  ;;  %s3444_s23 = smov [#allocation2]  }
  0x74   : > { %p3288_p7 = scmp.ne.s32.totalorder %s3676_s9, %s3287_s27  ;;  %s3292_s6 = sshll.u32 %s3444_s23, 4  ;;  %s3293_s6 = int_to_ptr.vmem [resolvable:$false] %s3292_s6 }
  0x75   : > { %s3294_s17 = scalar_lea.vmem %s3293_s6, 13824  ;;  %p3295_p5 = scmp.lt.s32.totalorder %s3676_s9, %s3293_s6 }
  0x76   : > { %p3290_p9 = pnand %p3288_p7, %p3274_p6  ;;  %p3296_p8 = scmp.lt.s32.totalorder %s3294_s17, %s3287_s27 }
  0x78   : > { %p3291_p11 = pneg %p3290_p9  ;;  %p3297_p12 = por %p3296_p8, %p3295_p5 }
  0x7a   : > { %p3298_p2 = pnand %p3297_p12, %p3291_p11 }
  0x7c   : > { %3301 = shalt.err (!%p3298_p2)
}
  0x7d   : > { %s3445_s24 = smov 192   ;;  %s3446_s1 = smov 12  }
  0x7e   : > { %2818 = dma.hbm_to_vmem [thread:$0]  (!%p3672_p4), %s3658_s8, 6912, %s3676_s9, %s3678_s15, %s3445_s24, %s3445_s24, %s3446_s1  }
  0x7f   : > { %p4002_p6 = scmp.ne.s32.totalorder %s3994_s19, 0 }
  0x80   : > { %s297_s12 = sand.u32 (!%p4002_p6), 1, %s3408_s28   ;;  %p4003_p10 = scmp.ne.s32.totalorder (!%p4002_p6), %s3989_s16, 0 }
  0x81   : > { %295 = sbr.rel (%p4002_p6) target bundleno = 793 (0x319), region = 48  ;;  %s298_s13 = scalar_lea.sflag (!%p4002_p6), [#allocation3], %s297_s12 }
  0x82   : > { %s2795_s22 = smul.u32 (!%p4002_p6), 432, %s297_s12 }
  0x84   : > { %s3709_s20 = scalar_lea.vmem (!%p4002_p6), [#allocation2], %s2795_s22 }
  0x88   : > { %3379 = dma.done.wait (%p4003_p10), %s298_s13, 6912  }
  0x89   : > { %3381 = vsyncadd (%p4003_p10), %s298_s13, 4294960384  ;;  %p4004_p0 = scmp.ne.s32.totalorder %s3988_s14, 0 }
  0x8b   : > { %3383 = dma.done.wait (%p4004_p0), [#allocation6], 20480  }
  0x8c   : > { %3385 = vsyncadd (%p4004_p0), [#allocation6], 4294946816  ;;  %s337_s9 = sand.u32 1, %s3396_s25   ;;  %s2421_s19 = sshll.u32 %s3416_s30, 7 }
  0x8d   : > { %s3723_s8 = sshll.u32 %s337_s9, 6  ;;  %s3726_s15 = smov 0  }
  0x8e   : > { %s339_s21 = scalar_lea.vmem [#allocation8], %s3723_s8 }
  0x8f LB: >> { %v2936_v0 = vld [vmem:[#allocation5 + $0x184] ss:$8 sps:$4 sm:$0xff]   ;;  %v3447_v2 = vmov 0   ;;  %v2940_v3 = vld [vmem:[#allocation5 + $0x180] ss:$8 sps:$4 sm:$0xff]   ;;  %s2422_s14 = sshll.u32 %s3436_s15, 6  ;;  %s3436_s15 = sphi %s3726_s15, %s348_s15  }
  0x90   : >> { %v2938_v1 = vld [vmem:[#allocation5 + $0x284] ss:$8 sps:$4 sm:$0xff]   ;;  %900 = vmatprep.mubr.bf16.mxu0 %v3447_v2  ;;  %795 = vmatprep.subr.bf16.mxu1 %v2936_v0  ;;  %v2941_v4 = vld [vmem:[#allocation5 + $0x280] ss:$8 sps:$4 sm:$0xff]   ;;  %v2942_v5 = vld [vmem:[#allocation5 + $0x194] ss:$8 sps:$4 sm:$0xff]   ;;  %s3737_s16 = sadd.s32 %s2422_s14, %s2421_s19 }
  0x91   : >> { %868 = vmatprep.subr.bf16.mxu0 %v2938_v1  ;;  %796 = vmatpush1.bf16.msra.mxu1 %v2940_v3  ;;  %v2944_v6 = vld [vmem:[#allocation5 + $0x294] ss:$8 sps:$4 sm:$0xff]   ;;  %v2946_v7 = vld [vmem:[#allocation5 + $0x190] ss:$8 sps:$4 sm:$0xff]   ;;  %v2948_v9 = vld [vmem:[#allocation5 + $0x1a4] ss:$8 sps:$4 sm:$0xff]  }
  0x92   : >> { %869 = vmatpush1.bf16.msra.mxu0 %v2941_v4  ;;  %797 = vmatprep.subr.bf16.mxu1 %v2942_v5  ;;  %v2947_v8 = vld [vmem:[#allocation5 + $0x290] ss:$8 sps:$4 sm:$0xff]   ;;  %v2950_v10 = vld [vmem:[#allocation5 + $0x2a4] ss:$8 sps:$4 sm:$0xff]   ;;  %v2952_v11 = vld [vmem:[#allocation5 + $0x1a0] ss:$8 sps:$4 sm:$0xff]  }
  0x93   : >> { %870 = vmatprep.subr.bf16.mxu0 %v2944_v6  ;;  %v2953_v12 = vld [vmem:[#allocation5 + $0x2a0] ss:$8 sps:$4 sm:$0xff]   ;;  %v2954_v13 = vld [vmem:[#allocation5 + $0x1b4] ss:$8 sps:$4 sm:$0xff]   ;;  %v2958_v15 = vld [vmem:[#allocation5 + $0x1b0] ss:$8 sps:$4 sm:$0xff]  }
  0x94   : >> { %v2956_v14 = vld [vmem:[#allocation5 + $0x2b4] ss:$8 sps:$4 sm:$0xff]   ;;  %s420_s27 = sadd.s32 16, %s3737_s16  ;;  %v2959_v16 = vld [vmem:[#allocation5 + $0x2b0] ss:$8 sps:$4 sm:$0xff]   ;;  %s351_s24 = sshra.s32 %s3737_s16, 3 }
  0x95   : >> { %798 = vmatpush1.bf16.msra.mxu1 %v2946_v7  ;;  %v2960_v17 = vld [vmem:[#allocation5 + $0x1c4] ss:$8 sps:$4 sm:$0xff]   ;;  %s421_s23 = sshra.s32 %s420_s27, 3  ;;  %v2964_v19 = vld [vmem:[#allocation5 + $0x1c0] ss:$8 sps:$4 sm:$0xff]   ;;  %s2639_s1 = smul.u32 12, %s351_s24 }
  0x96   : >> { %871 = vmatpush1.bf16.msra.mxu0 %v2947_v8  ;;  %799 = vmatprep.subr.bf16.mxu1 %v2948_v9  ;;  %v2962_v18 = vld [vmem:[#allocation5 + $0x2c4] ss:$8 sps:$4 sm:$0xff]   ;;  %v2965_v20 = vld [vmem:[#allocation5 + $0x2c0] ss:$8 sps:$4 sm:$0xff]   ;;  %v2966_v21 = vld [vmem:[#allocation5 + $0x1d4] ss:$8 sps:$4 sm:$0xff]  }
  0x97   : >> { %872 = vmatprep.subr.bf16.mxu0 %v2950_v10  ;;  %v2968_v22 = vld [vmem:[#allocation5 + $0x2d4] ss:$8 sps:$4 sm:$0xff]   ;;  %s2640_s6 = smul.u32 12, %s421_s23  ;;  %v2970_v23 = vld [vmem:[#allocation5 + $0x1d0] ss:$8 sps:$4 sm:$0xff]   ;;  %s3751_s12 = scalar_lea.vmem %s3709_s20, %s2639_s1 [#allocation2] }
  0x98   : >> { %v2971_v24 = vld [vmem:[#allocation5 + $0x2d0] ss:$8 sps:$4 sm:$0xff]   ;;  %v2972_v25 = vld [vmem:[#allocation5 + $0x1e4] ss:$8 sps:$4 sm:$0xff]   ;;  %v2976_v27 = vld [vmem:[#allocation5 + $0x1e0] ss:$8 sps:$4 sm:$0xff]  }
  0x99   : >> { %800 = vmatpush1.bf16.msra.mxu1 %v2952_v11  ;;  %v2974_v26 = vld [vmem:[#allocation5 + $0x2e4] ss:$8 sps:$4 sm:$0xff]   ;;  %s3741_s17 = scalar_lea.vmem %s3709_s20, %s2640_s6 [#allocation2]  ;;  %v2977_v28 = vld [vmem:[#allocation5 + $0x2e0] ss:$8 sps:$4 sm:$0xff]   ;;  %v2978_v29 = vld [vmem:[#allocation5 + $0x1f4] ss:$8 sps:$4 sm:$0xff]  }
  0x9a   : >> { %873 = vmatpush1.bf16.msra.mxu0 %v2953_v12  ;;  %801 = vmatprep.subr.bf16.mxu1 %v2954_v13  ;;  %v2980_v30 = vld [vmem:[#allocation5 + $0x2f4] ss:$8 sps:$4 sm:$0xff]   ;;  %v2982_v31 = vld [vmem:[#allocation5 + $0x1f0] ss:$8 sps:$4 sm:$0xff]   ;;  %v2984_v33 = vld [vmem:[#allocation5 + $0x204] ss:$8 sps:$4 sm:$0xff]  }
  0x9b   : >> { %874 = vmatprep.subr.bf16.mxu0 %v2956_v14  ;;  %v2983_v32 = vld [vmem:[#allocation5 + $0x2f0] ss:$8 sps:$4 sm:$0xff]   ;;  %v2989_v34 = vld [vmem:[#allocation5 + $0x104] ss:$8 sps:$4 sm:$0xff]   ;;  %v2986_v35 = vld [vmem:[%s3741_s17 + $0x8] ss:$12 sps:$4 sm:$0xff]  }
  0x9c   : >> { %v2987_v36 = vld [vmem:[#allocation5 + $0x100] ss:$8 sps:$4 sm:$0xff]   ;;  %v2991_v38 = vld [vmem:[#allocation5 + $0x214] ss:$8 sps:$4 sm:$0xff]   ;;  %v2993_v40 = vld [vmem:[#allocation5 + $0x110] ss:$8 sps:$4 sm:$0xff]  }
  0x9d   : >> { %802 = vmatpush1.bf16.msra.mxu1 %v2958_v15  ;;  %v2990_v37 = vld [vmem:[#allocation5 + $0x200] ss:$8 sps:$4 sm:$0xff]   ;;  %v2995_v39 = vld [vmem:[#allocation5 + $0x114] ss:$8 sps:$4 sm:$0xff]   ;;  %v2996_v41 = vld [vmem:[#allocation5 + $0x210] ss:$8 sps:$4 sm:$0xff]  }
  0x9e   : >> { %875 = vmatpush1.bf16.msra.mxu0 %v2959_v16  ;;  %803 = vmatprep.subr.bf16.mxu1 %v2960_v17  ;;  %v2997_v42 = vld [vmem:[#allocation5 + $0x224] ss:$8 sps:$4 sm:$0xff]   ;;  %v3000_v45 = vld [vmem:[#allocation5 + $0x120] ss:$8 sps:$4 sm:$0xff]   ;;  %v3004_v47 = vld [vmem:[#allocation5 + $0x234] ss:$8 sps:$4 sm:$0xff]  }
  0x9f   : >> { %876 = vmatprep.subr.bf16.mxu0 %v2962_v18  ;;  %v3002_v43 = vld [vmem:[#allocation5 + $0x124] ss:$8 sps:$4 sm:$0xff]   ;;  %v3003_v46 = vld [vmem:[#allocation5 + $0x220] ss:$8 sps:$4 sm:$0xff]   ;;  %v3008_v48 = vld [vmem:[#allocation5 + $0x134] ss:$8 sps:$4 sm:$0xff]  }
  0xa0   : >> { %v2999_v44 = vld [vmem:[%s3741_s17 + $0x20] ss:$12 sps:$4 sm:$0xff]   ;;  %v3006_v49 = vld [vmem:[#allocation5 + $0x130] ss:$8 sps:$4 sm:$0xff]   ;;  %v3017_v57 = vld [vmem:[#allocation5 + $0x254] ss:$8 sps:$4 sm:$0xff]  }
  0xa1   : >> { %804 = vmatpush1.bf16.msra.mxu1 %v2964_v19  ;;  %v3009_v50 = vld [vmem:[#allocation5 + $0x230] ss:$8 sps:$4 sm:$0xff]   ;;  %v3010_v51 = vld [vmem:[#allocation5 + $0x244] ss:$8 sps:$4 sm:$0xff]   ;;  %v3013_v54 = vld [vmem:[#allocation5 + $0x140] ss:$8 sps:$4 sm:$0xff]  }
  0xa2   : >> { %877 = vmatpush1.bf16.msra.mxu0 %v2965_v20  ;;  %805 = vmatprep.subr.bf16.mxu1 %v2966_v21  ;;  %v3015_v52 = vld [vmem:[#allocation5 + $0x144] ss:$8 sps:$4 sm:$0xff]   ;;  %v3016_v55 = vld [vmem:[#allocation5 + $0x240] ss:$8 sps:$4 sm:$0xff]   ;;  %v3021_v58 = vld [vmem:[#allocation5 + $0x154] ss:$8 sps:$4 sm:$0xff]  }
  0xa3   : >> { %878 = vmatprep.subr.bf16.mxu0 %v2968_v22  ;;  %v3012_v53 = vld [vmem:[%s3741_s17 + $0x38] ss:$12 sps:$4 sm:$0xff]   ;;  %v3025_v63 = vld [vmem:[%s3741_s17 + $0x50] ss:$12 sps:$4 sm:$0xff]   ;;  %v3026_v0 = vld [vmem:[#allocation5 + $0x160] ss:$8 sps:$4 sm:$0xff]  }
  0xa4   : >> { %v3038_v56 = vld [vmem:[%s3741_s17 + $0x4] ss:$12 sps:$4 sm:$0xff]   ;;  %v3029_v1 = vld [vmem:[#allocation5 + $0x260] ss:$8 sps:$4 sm:$0xff]   ;;  %v3030_v3 = vld [vmem:[#allocation5 + $0x274] ss:$8 sps:$4 sm:$0xff]  }
  0xa5   : >> { %806 = vmatpush1.bf16.msra.mxu1 %v2970_v23  ;;  %827 = vmatprep.mubr.bf16.mxu1 %v3038_v56  ;;  %v3019_v59 = vld [vmem:[#allocation5 + $0x150] ss:$8 sps:$4 sm:$0xff]   ;;  %v3023_v61 = vld [vmem:[#allocation5 + $0x264] ss:$8 sps:$4 sm:$0xff]   ;;  %v3034_v4 = vld [vmem:[#allocation5 + $0x174] ss:$8 sps:$4 sm:$0xff]  }
  0xa6   : >> { %879 = vmatpush1.bf16.msra.mxu0 %v2971_v24  ;;  %807 = vmatprep.subr.bf16.mxu1 %v2972_v25  ;;  %v3022_v60 = vld [vmem:[#allocation5 + $0x250] ss:$8 sps:$4 sm:$0xff]   ;;  %v3028_v62 = vld [vmem:[#allocation5 + $0x164] ss:$8 sps:$4 sm:$0xff]   ;;  %v3039_v10 = vld [vmem:[#allocation5] ss:$8 sps:$4 sm:$0xff]  }
  0xa7   : >> { %880 = vmatprep.subr.bf16.mxu0 %v2974_v26  ;;  %v3032_v5 = vld [vmem:[#allocation5 + $0x170] ss:$8 sps:$4 sm:$0xff]   ;;  %v3041_v7 = vld [vmem:[#allocation5 + $0x4] ss:$8 sps:$4 sm:$0xff]   ;;  %v3045_v11 = vld [vmem:[%s3751_s12 + $0x8] ss:$12 sps:$4 sm:$0xff]  }
  0xa8   : >> { %v3035_v6 = vld [vmem:[#allocation5 + $0x270] ss:$8 sps:$4 sm:$0xff]   ;;  %v3044_v8 = vld [vmem:[#allocation5 + $0x304] ss:$8 sps:$4 sm:$0xff]   ;;  %v3042_v12 = vld [vmem:[#allocation5 + $0x300] ss:$8 sps:$4 sm:$0xff]  }
  0xa9   : >> { %808 = vmatpush1.bf16.msra.mxu1 %v2976_v27  ;;  %v3036_v9 = vld [vmem:[%s3741_s17] ss:$12 sps:$4 sm:$0xff]   ;;  %v3048_v13 = vld [vmem:[#allocation5 + $0x14] ss:$8 sps:$4 sm:$0xff]   ;;  %v3046_v16 = vld [vmem:[#allocation5 + $0x10] ss:$8 sps:$4 sm:$0xff]  }
  0xaa   : >> { %881 = vmatpush1.bf16.msra.mxu0 %v2977_v28  ;;  %809 = vmatprep.subr.bf16.mxu1 %v2978_v29  ;;  %v3051_v14 = vld [vmem:[#allocation5 + $0x314] ss:$8 sps:$4 sm:$0xff]   ;;  %v3049_v17 = vld [vmem:[#allocation5 + $0x310] ss:$8 sps:$4 sm:$0xff]   ;;  %v3057_v18 = vld [vmem:[#allocation5 + $0x24] ss:$8 sps:$4 sm:$0xff]  }
  0xab   : >> { %882 = vmatprep.subr.bf16.mxu0 %v2980_v30  ;;  %v3052_v15 = vld [vmem:[%s3741_s17 + $0x1c] ss:$12 sps:$4 sm:$0xff]   ;;  %v3060_v19 = vld [vmem:[#allocation5 + $0x324] ss:$8 sps:$4 sm:$0xff]   ;;  %v3067_v25 = vld [vmem:[%s3741_s17 + $0x34] ss:$12 sps:$4 sm:$0xff]  }
  0xac   : >> { %v3054_v20 = vld [vmem:[%s3741_s17 + $0x18] ss:$12 sps:$4 sm:$0xff]   ;;  %v3055_v21 = vld [vmem:[#allocation5 + $0x20] ss:$8 sps:$4 sm:$0xff]   ;;  %v3063_v23 = vld [vmem:[#allocation5 + $0x34] ss:$8 sps:$4 sm:$0xff]  }
  0xad   : >> { %810 = vmatpush1.bf16.msra.mxu1 %v2982_v31  ;;  %v3058_v22 = vld [vmem:[#allocation5 + $0x320] ss:$8 sps:$4 sm:$0xff]   ;;  %v3066_v24 = vld [vmem:[#allocation5 + $0x334] ss:$8 sps:$4 sm:$0xff]   ;;  %v3061_v26 = vld [vmem:[#allocation5 + $0x30] ss:$8 sps:$4 sm:$0xff]  }
  0xae   : >> { %883 = vmatpush1.bf16.msra.mxu0 %v2983_v32  ;;  %811 = vmatprep.subr.bf16.mxu1 %v2984_v33  ;;  %v3064_v27 = vld [vmem:[#allocation5 + $0x330] ss:$8 sps:$4 sm:$0xff]   ;;  %v3072_v28 = vld [vmem:[#allocation5 + $0x44] ss:$8 sps:$4 sm:$0xff]   ;;  %v3070_v31 = vld [vmem:[#allocation5 + $0x40] ss:$8 sps:$4 sm:$0xff]  }
  0xaf   : >> { %1318 = vmatprep.subr.bf16.mxu0 %v2989_v34  ;;  %v3075_v29 = vld [vmem:[#allocation5 + $0x344] ss:$8 sps:$4 sm:$0xff]   ;;  %v3069_v30 = vld [vmem:[%s3741_s17 + $0x30] ss:$12 sps:$4 sm:$0xff]   ;;  %v3073_v32 = vld [vmem:[#allocation5 + $0x340] ss:$8 sps:$4 sm:$0xff]  }
  0xb0   : >> { %v3078_v33 = vld [vmem:[#allocation5 + $0x54] ss:$8 sps:$4 sm:$0xff]   ;;  %s1391_s22 = sadd.s32 32, %s3737_s16  ;;  %v3103_v56 = vld [vmem:[#allocation5 + $0x90] ss:$8 sps:$4 sm:$0xff]   ;;  %s348_s15 = sadd.s32 1, %s3436_s15  }
  0xb1   : >> { %901 = vmatmul.mubr.bf16.vlgmr.msra.gmra.mrb[0].mxu0 %v2986_v35  ;;  %812 = vmatpush1.bf16.msra.mxu1 %v2990_v37  ;;  %v3081_v34 = vld [vmem:[#allocation5 + $0x354] ss:$8 sps:$4 sm:$0xff]   ;;  %v3112_v35 = vld [vmem:[%s3751_s12 + $0x20] ss:$12 sps:$4 sm:$0xff]   ;;  %v3076_v37 = vld [vmem:[#allocation5 + $0x50] ss:$8 sps:$4 sm:$0xff]  }
  0xb2   : >> { %1319 = vmatpush1.bf16.msra.mxu0 %v2987_v36  ;;  %813 = vmatprep.subr.bf16.mxu1 %v2991_v38  ;;  %v3082_v36 = vld [vmem:[%s3741_s17 + $0x4c] ss:$12 sps:$4 sm:$0xff]   ;;  %s1392_s13 = sshra.s32 %s1391_s22, 3  ;;  %s2263_s22 = sshra.s32 %s2422_s14, 3 }
  0xb3   : >> { %1320 = vmatprep.subr.bf16.mxu0 %v2995_v39  ;;  %910 = vmatprep.mubr.bf16.mxu0 %v3447_v2  ;;  %v3079_v38 = vld [vmem:[#allocation5 + $0x350] ss:$8 sps:$4 sm:$0xff]   ;;  %v3084_v39 = vld [vmem:[%s3741_s17 + $0x48] ss:$12 sps:$4 sm:$0xff]   ;;  %s2641_s16 = smul.u32 12, %s1392_s13  ;;  %s2632_s23 = sshll.u32 %s2263_s22, 2 }
  0xb4   : >> { %s3878_s6 = scalar_lea.vmem %s339_s21, %s2632_s23 [#allocation8]  ;;  %p345_p4 = scmp.ge.s32.totalorder %s348_s15, 2  }
  0xb5   : >> { %814 = vmatpush1.bf16.msra.mxu1 %v2996_v41  ;;  %v3090_v41 = vld [vmem:[#allocation5 + $0x364] ss:$8 sps:$4 sm:$0xff]   ;;  %s3772_s27 = scalar_lea.vmem %s3709_s20, %s2641_s16 [#allocation2]  ;;  %s4006_s14 = sld [smem:[#allocation13_spill]] (%p345_p4) }
  0xb6   : >> { %1321 = vmatpush1.bf16.msra.mxu0 %v2993_v40  ;;  %815 = vmatprep.subr.bf16.mxu1 %v2997_v42  ;;  %v3087_v40 = vld [vmem:[#allocation5 + $0x64] ss:$8 sps:$4 sm:$0xff]   ;;  %v3085_v42 = vld [vmem:[#allocation5 + $0x60] ss:$8 sps:$4 sm:$0xff]   ;;  %s4007_s17 = sld [smem:[#allocation15_spill]] (%p345_p4)  ;;  %s2634_s24 = sshll.u32 (%p345_p4), %s3416_s30, 4 }
  0xb7   : >> { %1322 = vmatprep.subr.bf16.mxu0 %v3002_v43  ;;  %v3088_v43 = vld [vmem:[#allocation5 + $0x360] ss:$8 sps:$4 sm:$0xff]   ;;  %s4008_s15 = sld [smem:[#allocation21_spill]] (%p345_p4)  ;;  %s3900_s20 = scalar_lea.sflag (%p345_p4), [#allocation4], %s337_s9 }
  0xb8   : > { %s3448_s30 = smov (%p345_p4), [#allocation8]  }
  0xb9   : >> { %911 = vmatmul.mubr.bf16.gmra.mrb[4].mxu0 %v2999_v44  ;;  %816 = vmatpush1.bf16.msra.mxu1 %v3003_v46  ;;  %v3125_v44 = vld [vmem:[%s3751_s12 + $0x38] ss:$12 sps:$4 sm:$0xff]   ;;  %v3096_v46 = vld [vmem:[#allocation5 + $0x374] ss:$8 sps:$4 sm:$0xff]   ;;  %s3306_s8 = sshll.u32 (%p345_p4), %s3448_s30, 4  ;;  %s3307_s8 = int_to_ptr.vmem [resolvable:$false] %s3306_s8 }
  0xba   : >> { %1323 = vmatpush1.bf16.msra.mxu0 %v3000_v45  ;;  %817 = vmatprep.subr.bf16.mxu1 %v3004_v47  ;;  %v3093_v45 = vld [vmem:[#allocation5 + $0x74] ss:$8 sps:$4 sm:$0xff]   ;;  %v3091_v47 = vld [vmem:[#allocation5 + $0x70] ss:$8 sps:$4 sm:$0xff]  }
  0xbb   : >> { %1324 = vmatprep.subr.bf16.mxu0 %v3008_v48  ;;  %920 = vmatprep.mubr.bf16.mxu0 %v3447_v2  ;;  %v3094_v48 = vld [vmem:[#allocation5 + $0x370] ss:$8 sps:$4 sm:$0xff]   ;;  %s2635_s1 = sshll.u32 (%p345_p4), %s4006_s14, 5 }
  0xbc   : > { %s2288_s22 = sadd.s32 (%p345_p4), %s2635_s1, %s2634_s24  ;;  %p4009_p3 = scmp.ne.s32.totalorder (%p345_p4), %s4007_s17, 0 }
  0xbd   : >> { %818 = vmatpush1.bf16.msra.mxu1 %v3009_v50  ;;  %v3102_v50 = vld [vmem:[#allocation5 + $0x384] ss:$8 sps:$4 sm:$0xff]   ;;  %s2636_s13 = sshll.u32 (%p345_p4), %s2288_s22, 6 }
  0xbe   : >> { %1325 = vmatpush1.bf16.msra.mxu0 %v3006_v49  ;;  %819 = vmatprep.subr.bf16.mxu1 %v3010_v51  ;;  %v3099_v49 = vld [vmem:[#allocation5 + $0x84] ss:$8 sps:$4 sm:$0xff]   ;;  %v3097_v51 = vld [vmem:[#allocation5 + $0x80] ss:$8 sps:$4 sm:$0xff]   ;;  %s3896_s23 = scalar_lea.hbm (%p345_p4), %s4008_s15, %s2636_s13 }
  0xbf   : >> { %1326 = vmatprep.subr.bf16.mxu0 %v3015_v52  ;;  %v3100_v52 = vld [vmem:[#allocation5 + $0x380] ss:$8 sps:$4 sm:$0xff]  }
  0xc1   : >> { %921 = vmatmul.mubr.bf16.gmra.mrb[8].mxu0 %v3012_v53  ;;  %820 = vmatpush1.bf16.msra.mxu1 %v3016_v55  ;;  %v3138_v53 = vld [vmem:[%s3751_s12 + $0x50] ss:$12 sps:$4 sm:$0xff]  }
  0xc2   : >> { %1327 = vmatpush1.bf16.msra.mxu0 %v3013_v54  ;;  %821 = vmatprep.subr.bf16.mxu1 %v3017_v57  ;;  %v3105_v54 = vld [vmem:[#allocation5 + $0x94] ss:$8 sps:$4 sm:$0xff]   ;;  %v3106_v57 = vld [vmem:[#allocation5 + $0x390] ss:$8 sps:$4 sm:$0xff]  }
  0xc3   : >> { %1328 = vmatprep.subr.bf16.mxu0 %v3021_v58  ;;  %930 = vmatprep.mubr.bf16.mxu0 %v3447_v2  ;;  %v3108_v55 = vld [vmem:[#allocation5 + $0x394] ss:$8 sps:$4 sm:$0xff]   ;;  %v3111_v58 = vld [vmem:[#allocation5 + $0xa4] ss:$8 sps:$4 sm:$0xff]  }
  0xc5   : >> { %822 = vmatpush1.bf16.msra.mxu1 %v3022_v60  ;;  %v3115_v60 = vld [vmem:[#allocation5 + $0x3a4] ss:$8 sps:$4 sm:$0xff]  }
  0xc6   : >> { %1329 = vmatpush1.bf16.msra.mxu0 %v3019_v59  ;;  %823 = vmatprep.subr.bf16.mxu1 %v3023_v61  ;;  %v3150_v59 = vld [vmem:[%s3751_s12 + $0x4] ss:$12 sps:$4 sm:$0xff]  }
  0xc7   : >> { %1330 = vmatprep.subr.bf16.mxu0 %v3028_v62  ;;  %v3153_v61 = vld [vmem:[%s3772_s27 + $0x4] ss:$12 sps:$4 sm:$0xff]   ;;  %v3109_v62 = vld [vmem:[#allocation5 + $0xa0] ss:$8 sps:$4 sm:$0xff]  }
  0xc9   : >> { %931 = vmatmul.mubr.bf16.gmra.mrb[12].mxu0 %v3025_v63  ;;  %824 = vmatpush1.bf16.msra.mxu1 %v3029_v1  ;;  %v3113_v63 = vld [vmem:[#allocation5 + $0x3a0] ss:$8 sps:$4 sm:$0xff]   ;;  %v3121_v1 = vld [vmem:[#allocation5 + $0x3b4] ss:$8 sps:$4 sm:$0xff]  }
  0xca   : >> { %1331 = vmatpush1.bf16.msra.mxu0 %v3026_v0  ;;  %825 = vmatprep.subr.bf16.mxu1 %v3030_v3  ;;  %v3118_v0 = vld [vmem:[#allocation5 + $0xb4] ss:$8 sps:$4 sm:$0xff]   ;;  %v3116_v3 = vld [vmem:[#allocation5 + $0xb0] ss:$8 sps:$4 sm:$0xff]  }
  0xcb   : >> { %1332 = vmatprep.subr.bf16.mxu0 %v3034_v4  ;;  %1350 = vmatprep.mubr.bf16.mxu0 %v3447_v2  ;;  %v3119_v4 = vld [vmem:[#allocation5 + $0x3b0] ss:$8 sps:$4 sm:$0xff]  }
  0xcd   : >> { %826 = vmatpush1.bf16.msra.mxu1 %v3035_v6  ;;  %v3128_v6 = vld [vmem:[#allocation5 + $0x3c4] ss:$8 sps:$4 sm:$0xff]  }
  0xce   : >> { %1333 = vmatpush1.bf16.msra.mxu0 %v3032_v5  ;;  %1245 = vmatprep.subr.bf16.mxu1 %v3041_v7  ;;  %v3124_v5 = vld [vmem:[#allocation5 + $0xc4] ss:$8 sps:$4 sm:$0xff]   ;;  %v3122_v7 = vld [vmem:[#allocation5 + $0xc0] ss:$8 sps:$4 sm:$0xff]  }
  0xcf   : >> { %1766 = vmatprep.subr.bf16.mxu0 %v3044_v8  ;;  %v3126_v8 = vld [vmem:[#allocation5 + $0x3c0] ss:$8 sps:$4 sm:$0xff]  }
  0xd0   : >> { %828 = vmatmul.mubr.bf16.vlgmr.msra.gmra.mrb[0].mxu1 %v3036_v9  ;;  %v3131_v9 = vld [vmem:[#allocation5 + $0xd4] ss:$8 sps:$4 sm:$0xff]  }
  0xd1   : >> { %1351 = vmatmul.mubr.bf16.vlgmr.msra.gmra.mrb[16].mxu0 %v3045_v11  ;;  %1246 = vmatpush1.bf16.msra.mxu1 %v3039_v10  ;;  %v3134_v10 = vld [vmem:[#allocation5 + $0x3d4] ss:$8 sps:$4 sm:$0xff]   ;;  %v3129_v11 = vld [vmem:[#allocation5 + $0xd0] ss:$8 sps:$4 sm:$0xff]  }
  0xd2   : >> { %1767 = vmatpush1.bf16.msra.mxu0 %v3042_v12  ;;  %1247 = vmatprep.subr.bf16.mxu1 %v3048_v13  ;;  %v3132_v12 = vld [vmem:[#allocation5 + $0x3d0] ss:$8 sps:$4 sm:$0xff]   ;;  %v3137_v13 = vld [vmem:[#allocation5 + $0xe4] ss:$8 sps:$4 sm:$0xff]  }
  0xd3   : >> { %1768 = vmatprep.subr.bf16.mxu0 %v3051_v14  ;;  %837 = vmatprep.mubr.bf16.mxu1 %v3052_v15  ;;  %v3141_v14 = vld [vmem:[#allocation5 + $0x3e4] ss:$8 sps:$4 sm:$0xff]   ;;  %v3135_v15 = vld [vmem:[#allocation5 + $0xe0] ss:$8 sps:$4 sm:$0xff]  }
  0xd4   : >> { %1360 = vmatprep.mubr.bf16.mxu0 %v3447_v2 }
  0xd5   : >> { %1248 = vmatpush1.bf16.msra.mxu1 %v3046_v16  ;;  %v3139_v16 = vld [vmem:[#allocation5 + $0x3e0] ss:$8 sps:$4 sm:$0xff]  }
  0xd6   : >> { %1769 = vmatpush1.bf16.msra.mxu0 %v3049_v17  ;;  %1249 = vmatprep.subr.bf16.mxu1 %v3057_v18  ;;  %v3144_v17 = vld [vmem:[#allocation5 + $0xf4] ss:$8 sps:$4 sm:$0xff]  }
  0xd7   : >> { %1770 = vmatprep.subr.bf16.mxu0 %v3060_v19  ;;  %v3147_v18 = vld [vmem:[#allocation5 + $0x3f4] ss:$8 sps:$4 sm:$0xff]   ;;  %v3142_v19 = vld [vmem:[#allocation5 + $0xf0] ss:$8 sps:$4 sm:$0xff]  }
  0xd8   : >> { %838 = vmatmul.mubr.bf16.gmra.mrb[4].mxu1 %v3054_v20  ;;  %v3145_v20 = vld [vmem:[#allocation5 + $0x3f0] ss:$8 sps:$4 sm:$0xff]  }
  0xd9   : >> { %1250 = vmatpush1.bf16.msra.mxu1 %v3055_v21  ;;  %847 = vmatprep.mubr.bf16.mxu1 %v3067_v25  ;;  %v3156_v21 = vld [vmem:[#allocation5 + $0x404] ss:$8 sps:$4 sm:$0xff]   ;;  %v3160_v25 = vld [vmem:[%s3751_s12 + $0x1c] ss:$12 sps:$4 sm:$0xff]  }
  0xda   : >> { %1771 = vmatpush1.bf16.msra.mxu0 %v3058_v22  ;;  %1251 = vmatprep.subr.bf16.mxu1 %v3063_v23  ;;  %v3148_v22 = vld [vmem:[%s3751_s12] ss:$12 sps:$4 sm:$0xff]  }
  0xdb   : >> { %1772 = vmatprep.subr.bf16.mxu0 %v3066_v24  ;;  %1361 = vmatmul.mubr.bf16.gmra.mrb[20].mxu0 %v3112_v35  ;;  %v3151_v23 = vld [vmem:[%s3772_s27] ss:$12 sps:$4 sm:$0xff]  }
  0xdc   : >> { %1370 = vmatprep.mubr.bf16.mxu0 %v3447_v2  ;;  %v3154_v24 = vld [vmem:[#allocation5 + $0x400] ss:$8 sps:$4 sm:$0xff]  }
  0xdd   : >> { %1252 = vmatpush1.bf16.msra.mxu1 %v3061_v26  ;;  %v3159_v26 = vld [vmem:[#allocation5 + $0x414] ss:$8 sps:$4 sm:$0xff]  }
  0xde   : >> { %1773 = vmatpush1.bf16.msra.mxu0 %v3064_v27  ;;  %1253 = vmatprep.subr.bf16.mxu1 %v3072_v28  ;;  %v3162_v27 = vld [vmem:[%s3772_s27 + $0x1c] ss:$12 sps:$4 sm:$0xff]   ;;  %v3157_v28 = vld [vmem:[#allocation5 + $0x410] ss:$8 sps:$4 sm:$0xff]   ;;  %v3174_v35 = vld [vmem:[%s3772_s27 + $0x34] ss:$12 sps:$4 sm:$0xff]  }
  0xdf   : >> { %1774 = vmatprep.subr.bf16.mxu0 %v3075_v29  ;;  %v3168_v29 = vld [vmem:[#allocation5 + $0x424] ss:$8 sps:$4 sm:$0xff]  }
  0xe0   : >> { %848 = vmatmul.mubr.bf16.gmra.mrb[8].mxu1 %v3069_v30  ;;  %v3164_v30 = vld [vmem:[%s3751_s12 + $0x18] ss:$12 sps:$4 sm:$0xff]  }
  0xe1   : >> { %1254 = vmatpush1.bf16.msra.mxu1 %v3070_v31  ;;  %857 = vmatprep.mubr.bf16.mxu1 %v3082_v36  ;;  %v3165_v31 = vld [vmem:[%s3772_s27 + $0x18] ss:$12 sps:$4 sm:$0xff]  }
  0xe2   : >> { %1775 = vmatpush1.bf16.msra.mxu0 %v3073_v32  ;;  %1255 = vmatprep.subr.bf16.mxu1 %v3078_v33  ;;  %v3166_v32 = vld [vmem:[#allocation5 + $0x420] ss:$8 sps:$4 sm:$0xff]   ;;  %v3169_v36 = vld [vmem:[#allocation5 + $0x430] ss:$8 sps:$4 sm:$0xff]  }
  0xe3   : >> { %1776 = vmatprep.subr.bf16.mxu0 %v3081_v34  ;;  %1371 = vmatmul.mubr.bf16.gmra.mrb[24].mxu0 %v3125_v44  ;;  %v3172_v33 = vld [vmem:[%s3751_s12 + $0x34] ss:$12 sps:$4 sm:$0xff]   ;;  %v3181_v44 = vld [vmem:[#allocation5 + $0x450] ss:$8 sps:$4 sm:$0xff]  }
  0xe4   : >> { %1380 = vmatprep.mubr.bf16.mxu0 %v3447_v2  ;;  %v3171_v34 = vld [vmem:[#allocation5 + $0x434] ss:$8 sps:$4 sm:$0xff]  }
  0xe5   : >> { %1256 = vmatpush1.bf16.msra.mxu1 %v3076_v37  ;;  %v3180_v37 = vld [vmem:[#allocation5 + $0x444] ss:$8 sps:$4 sm:$0xff]  }
  0xe6   : >> { %1777 = vmatpush1.bf16.msra.mxu0 %v3079_v38  ;;  %1257 = vmatprep.subr.bf16.mxu1 %v3087_v40  ;;  %v3176_v38 = vld [vmem:[%s3751_s12 + $0x30] ss:$12 sps:$4 sm:$0xff]   ;;  %v3178_v40 = vld [vmem:[#allocation5 + $0x440] ss:$8 sps:$4 sm:$0xff]  }
  0xe7   : >> { %1778 = vmatprep.subr.bf16.mxu0 %v3090_v41  ;;  %v3184_v41 = vld [vmem:[%s3751_s12 + $0x4c] ss:$12 sps:$4 sm:$0xff]  }
  0xe8   : >> { %858 = vmatmul.mubr.bf16.gmra.mrb[12].mxu1 %v3084_v39  ;;  %v3177_v39 = vld [vmem:[%s3772_s27 + $0x30] ss:$12 sps:$4 sm:$0xff]  }
  0xe9   : >> { %1258 = vmatpush1.bf16.msra.mxu1 %v3085_v42  ;;  %1277 = vmatprep.mubr.bf16.mxu1 %v3150_v59  ;;  %v3183_v42 = vld [vmem:[#allocation5 + $0x454] ss:$8 sps:$4 sm:$0xff]  }
  0xea   : >> { %1779 = vmatpush1.bf16.msra.mxu0 %v3088_v43  ;;  %1259 = vmatprep.subr.bf16.mxu1 %v3093_v45  ;;  %v3186_v43 = vld [vmem:[%s3772_s27 + $0x4c] ss:$12 sps:$4 sm:$0xff]   ;;  %v3204_v59 = vld [vmem:[#allocation7 + $0x50] sm:$0xff]  }
  0xeb   : >> { %1780 = vmatprep.subr.bf16.mxu0 %v3096_v46  ;;  %1381 = vmatmul.mubr.bf16.gmra.mrb[28].mxu0 %v3138_v53  ;;  %v3192_v45 = vld [vmem:[#allocation5 + $0x464] ss:$8 sps:$4 sm:$0xff]   ;;  %v3188_v46 = vld [vmem:[%s3751_s12 + $0x48] ss:$12 sps:$4 sm:$0xff]   ;;  %s2291_s12 = sshll.u32 (%p345_p4), %s339_s21, 4  ;;  %s3308_s21 = scalar_lea.vmem (%p345_p4), %s3307_s8, 2048  ;;  %s3891_s12 = int_to_ptr.vmem [resolvable:$true] %s2291_s12 }
  0xec   : >> { %1798 = vmatprep.mubr.bf16.mxu0 %v3153_v61  ;;  %v3198_v53 = vld [vmem:[%s3772_s27 + $0x38] ss:$12 sps:$4 sm:$0xff]   ;;  %s3302_s19 = scalar_lea.vmem (%p345_p4), %s3891_s12, 1024  ;;  %p3309_p9 = scmp.lt.s32.totalorder (%p345_p4), %s3891_s12, %s3307_s8 }
  0xed   : >> { %1260 = vmatpush1.bf16.msra.mxu1 %v3091_v47  ;;  %v3189_v47 = vld [vmem:[%s3772_s27 + $0x48] ss:$12 sps:$4 sm:$0xff]   ;;  %v3206_v61 = vld [vmem:[#allocation7 + $0x58] sm:$0xff]   ;;  %p3303_p1 = scmp.ne.s32.totalorder (%p345_p4), %s3891_s12, %s3302_s19  ;;  %p3310_p11 = scmp.lt.s32.totalorder (%p345_p4), %s3308_s21, %s3302_s19 }
  0xee   : >> { %1781 = vmatpush1.bf16.msra.mxu0 %v3094_v48  ;;  %1261 = vmatprep.subr.bf16.mxu1 %v3099_v49  ;;  %v3190_v48 = vld [vmem:[#allocation5 + $0x460] ss:$8 sps:$4 sm:$0xff]   ;;  %v3195_v49 = vld [vmem:[#allocation5 + $0x474] ss:$8 sps:$4 sm:$0xff]  }
  0xef   : >> { %1782 = vmatprep.subr.bf16.mxu0 %v3102_v50  ;;  %v3193_v50 = vld [vmem:[#allocation5 + $0x470] ss:$8 sps:$4 sm:$0xff]   ;;  %p3304_p13 = pnand (%p345_p4), %p3303_p1, %p4009_p3  ;;  %p3311_p5 = por (%p345_p4), %p3310_p11, %p3309_p9 }
  0xf1   : >> { %1262 = vmatpush1.bf16.msra.mxu1 %v3097_v51  ;;  %v3196_v51 = vld [vmem:[%s3772_s27 + $0x8] ss:$12 sps:$4 sm:$0xff]   ;;  %p3305_p7 = pneg (%p345_p4), %p3304_p13 }
  0xf2   : >> { %1783 = vmatpush1.bf16.msra.mxu0 %v3100_v52  ;;  %1263 = vmatprep.subr.bf16.mxu1 %v3105_v54  ;;  %v3197_v52 = vld [vmem:[%s3772_s27 + $0x20] ss:$12 sps:$4 sm:$0xff]   ;;  %v3199_v54 = vld [vmem:[%s3772_s27 + $0x50] ss:$12 sps:$4 sm:$0xff]   ;;  %s4005_s27 = sld [smem:[#allocation20_spill]] }
  0xf3   : >> { %1784 = vmatprep.subr.bf16.mxu0 %v3108_v55  ;;  %v3200_v55 = vld [vmem:[#allocation7 + $0x40] sm:$0xff]   ;;  %p3312_p8 = pnand (%p345_p4), %p3311_p5, %p3305_p7 }
  0xf5   : >> { %1264 = vmatpush1.bf16.msra.mxu1 %v3103_v56  ;;  %v3201_v56 = vld [vmem:[#allocation7] sm:$0xff]  }
  0xf6   : >> { %1785 = vmatpush1.bf16.msra.mxu0 %v3106_v57  ;;  %1265 = vmatprep.subr.bf16.mxu1 %v3111_v58  ;;  %v3202_v57 = vld [vmem:[#allocation7 + $0x48] sm:$0xff]  }
  0xf7   : >> { %1786 = vmatprep.subr.bf16.mxu0 %v3115_v60  ;;  %v3203_v58 = vld [vmem:[#allocation7 + $0x8] sm:$0xff]   ;;  %v3205_v60 = vld [vmem:[#allocation7 + $0x10] sm:$0xff]  }
  0xf9   : >> { %1266 = vmatpush1.bf16.msra.mxu1 %v3109_v62  ;;  %v3207_v62 = vld [vmem:[#allocation7 + $0x18] sm:$0xff]  }
  0xfa   : >> { %1787 = vmatpush1.bf16.msra.mxu0 %v3113_v63  ;;  %1267 = vmatprep.subr.bf16.mxu1 %v3118_v0  ;;  %v3208_v63 = vld [vmem:[#allocation7 + $0x60] sm:$0xff]  }
  0xfb   : >> { %1788 = vmatprep.subr.bf16.mxu0 %v3121_v1 }
  0xfd   : >> { %1268 = vmatpush1.bf16.msra.mxu1 %v3116_v3  ;;  %v3210_v3 = vld [vmem:[#allocation7 + $0x68] sm:$0xff]  }
  0xfe   : >> { %1789 = vmatpush1.bf16.msra.mxu0 %v3119_v4  ;;  %1269 = vmatprep.subr.bf16.mxu1 %v3124_v5  ;;  %v3211_v5 = vld [vmem:[#allocation7 + $0x28] sm:$0xff]  }
  0xff   : >> { %1790 = vmatprep.subr.bf16.mxu0 %v3128_v6 }
 0x101   : >> { %1270 = vmatpush1.bf16.msra.mxu1 %v3122_v7  ;;  %v3212_v7 = vld [vmem:[#allocation7 + $0x70] sm:$0xff]  }
 0x102   : >> { %1791 = vmatpush1.bf16.msra.mxu0 %v3126_v8  ;;  %1271 = vmatprep.subr.bf16.mxu1 %v3131_v9  ;;  %v3213_v8 = vld [vmem:[#allocation7 + $0x30] sm:$0xff]  }
 0x103   : >> { %1792 = vmatprep.subr.bf16.mxu0 %v3134_v10 }
 0x105   : >> { %1272 = vmatpush1.bf16.msra.mxu1 %v3129_v11  ;;  %v3214_v11 = vld [vmem:[#allocation7 + $0x78] sm:$0xff]  }
 0x106   : >> { %1793 = vmatpush1.bf16.msra.mxu0 %v3132_v12  ;;  %1273 = vmatprep.subr.bf16.mxu1 %v3137_v13  ;;  %v3215_v13 = vld [vmem:[#allocation7 + $0x38] sm:$0xff]  }
 0x107   : >> { %1794 = vmatprep.subr.bf16.mxu0 %v3141_v14 }
 0x109   : >> { %1274 = vmatpush1.bf16.msra.mxu1 %v3135_v15 }
 0x10a   : >> { %1795 = vmatpush1.bf16.msra.mxu0 %v3139_v16  ;;  %1275 = vmatprep.subr.bf16.mxu1 %v3144_v17 }
 0x10b   : >> { %1796 = vmatprep.subr.bf16.mxu0 %v3147_v18 }
 0x10d   : >> { %1276 = vmatpush1.bf16.msra.mxu1 %v3142_v19 }
 0x10e   : >> { %1797 = vmatpush1.bf16.msra.mxu0 %v3145_v20  ;;  %2673 = vmatprep.subr.bf16.mxu1 %v3200_v55 }
 0x10f   : >> { %1839 = vmatprep.subr.bf16.mxu0 %v3156_v21 }
 0x110   : >> { %1278 = vmatmul.mubr.bf16.vlgmr.msra.gmra.mrb[16].mxu1 %v3148_v22 }
 0x111   : >> { %1799 = vmatmul.mubr.bf16.vlgmr.msra.gmra.mrb[16].mxu0 %v3151_v23  ;;  %1287 = vmatprep.mubr.bf16.mxu1 %v3160_v25 }
 0x112   : >> { %1840 = vmatpush1.bf16.msra.mxu0 %v3154_v24  ;;  %1808 = vmatprep.mubr.bf16.mxu0 %v3162_v27 }
 0x113   : >> { %1841 = vmatprep.subr.bf16.mxu0 %v3159_v26  ;;  %2674 = vmatpush3.bf16.msra.mxu1 %v3201_v56 }
 0x114   : >> { %2675 = vmatprep.subr.bf16.mxu1 %v3202_v57 }
 0x116   : >> { %1842 = vmatpush1.bf16.msra.mxu0 %v3157_v28 }
 0x117   : >> { %1843 = vmatprep.subr.bf16.mxu0 %v3168_v29  ;;  %2676 = vmatpush3.bf16.msra.mxu1 %v3203_v58 }
 0x118   : >> { %1288 = vmatmul.mubr.bf16.gmra.mrb[20].mxu1 %v3164_v30  ;;  %2677 = vmatprep.subr.bf16.mxu1 %v3204_v59 }
 0x119   : >> { %1809 = vmatmul.mubr.bf16.gmra.mrb[20].mxu0 %v3165_v31  ;;  %1297 = vmatprep.mubr.bf16.mxu1 %v3172_v33 }
 0x11a   : >> { %1844 = vmatpush1.bf16.msra.mxu0 %v3166_v32  ;;  %1818 = vmatprep.mubr.bf16.mxu0 %v3174_v35 }
 0x11b   : >> { %1845 = vmatprep.subr.bf16.mxu0 %v3171_v34  ;;  %2678 = vmatpush3.bf16.msra.mxu1 %v3205_v60 }
 0x11c   : >> { %2679 = vmatprep.subr.bf16.mxu1 %v3206_v61 }
 0x11e   : >> { %1846 = vmatpush1.bf16.msra.mxu0 %v3169_v36 }
 0x11f   : >> { %1847 = vmatprep.subr.bf16.mxu0 %v3180_v37  ;;  %2680 = vmatpush3.bf16.msra.mxu1 %v3207_v62 }
 0x120   : >> { %1298 = vmatmul.mubr.bf16.gmra.mrb[24].mxu1 %v3176_v38  ;;  %2681 = vmatprep.subr.bf16.mxu1 %v3208_v63 }
 0x121   : >> { %1819 = vmatmul.mubr.bf16.gmra.mrb[24].mxu0 %v3177_v39  ;;  %1307 = vmatprep.mubr.bf16.mxu1 %v3184_v41 }
 0x122   : >> { %1848 = vmatpush1.bf16.msra.mxu0 %v3178_v40  ;;  %1828 = vmatprep.mubr.bf16.mxu0 %v3186_v43 }
 0x123   : >> { %1849 = vmatprep.subr.bf16.mxu0 %v3183_v42 }
 0x126   : >> { %1850 = vmatpush1.bf16.msra.mxu0 %v3181_v44 }
 0x127   : >> { %1851 = vmatprep.subr.bf16.mxu0 %v3192_v45 }
 0x128   : >> { %1308 = vmatmul.mubr.bf16.gmra.mrb[28].mxu1 %v3188_v46 }
 0x129   : >> { %1829 = vmatmul.mubr.bf16.gmra.mrb[28].mxu0 %v3189_v47 }
 0x12a   : >> { %1852 = vmatpush1.bf16.msra.mxu0 %v3190_v48  ;;  %1871 = vmatprep.mubr.bf16.mxu0 %v3447_v2 }
 0x12b   : >> { %1853 = vmatprep.subr.bf16.mxu0 %v3195_v49 }
 0x12e   : >> { %1854 = vmatpush1.bf16.msra.mxu0 %v3193_v50 }
 0x131   : >> { %1872 = vmatmul.mubr.bf16.vlgmr.msra.gmra.mrb[16].mxu0 %v3196_v51 }
 0x132   : >> { %1881 = vmatprep.mubr.bf16.mxu0 %v3447_v2 }
 0x139   : >> { %1882 = vmatmul.mubr.bf16.gmra.mrb[20].mxu0 %v3197_v52 }
 0x13a   : >> { %1891 = vmatprep.mubr.bf16.mxu0 %v3447_v2 }
 0x141   : >> { %1892 = vmatmul.mubr.bf16.gmra.mrb[24].mxu0 %v3198_v53 }
 0x142   : >> { %1901 = vmatprep.mubr.bf16.mxu0 %v3447_v2  ;;  %v3209_v2 = vld [vmem:[#allocation7 + $0x20] sm:$0xff]  }
 0x143   : >> { %2682 = vmatpush3.bf16.msra.mxu1 %v3209_v2 }
 0x144   : >> { %2683 = vmatprep.subr.bf16.mxu1 %v3210_v3 }
 0x147   : >> { %2684 = vmatpush3.bf16.msra.mxu1 %v3211_v5 }
 0x148   : >> { %2685 = vmatprep.subr.bf16.mxu1 %v3212_v7 }
 0x149   : >> { %1902 = vmatmul.mubr.bf16.gmra.mrb[28].mxu0 %v3199_v54 }
 0x14b   : >> { %2686 = vmatpush3.bf16.msra.mxu1 %v3213_v8 }
 0x14c   : >> { %2687 = vmatprep.subr.bf16.mxu1 %v3214_v11 }
 0x14f   : >> { %2688 = vmatpush3.bf16.msra.mxu1 %v3215_v13 }
 0x184   : >> { %v902_v0 = vpop.f32.mrb[0].mxu0 }
 0x185   : >> { %v904_v1 = vpop.f32.mrb[1].mxu0 }
 0x186   : >> { %v906_v4 = vpop.f32.mrb[2].mxu0 }
 0x187   : >> { %v908_v6 = vpop.f32.mrb[3].mxu0 }
 0x18c   : >> { %v912_v9 = vpop.f32.mrb[4].mxu0 }
 0x18d   : >> { %v914_v10 = vpop.f32.mrb[5].mxu0 }
 0x18e   : >> { %v916_v12 = vpop.f32.mrb[6].mxu0 }
 0x18f   : >> { %v918_v14 = vpop.f32.mrb[7].mxu0 }
 0x194   : >> { %v922_v15 = vpop.f32.mrb[8].mxu0 }
 0x195   : >> { %v924_v16 = vpop.f32.mrb[9].mxu0 }
 0x196   : >> { %v926_v17 = vpop.f32.mrb[10].mxu0 }
 0x197   : >> { %v928_v18 = vpop.f32.mrb[11].mxu0 }
 0x19c   : >> { %v932_v19 = vpop.f32.mrb[12].mxu0 }
 0x19d   : >> { %v934_v20 = vpop.f32.mrb[13].mxu0 }
 0x19e   : >> { %v936_v21 = vpop.f32.mrb[14].mxu0 }
 0x19f   : >> { %v938_v22 = vpop.f32.mrb[15].mxu0 }
 0x1a3   : >> { %v829_v23 = vpop.f32.mrb[0].mxu1 }
 0x1a4   : >> { %v903_v24 = vadd.f32 %v902_v0, %v829_v23  ;;  %v831_v25 = vpop.f32.mrb[1].mxu1 }
 0x1a5   : >> { %v905_v26 = vadd.f32 %v904_v1, %v831_v25  ;;  %v833_v27 = vpop.f32.mrb[2].mxu1 }
 0x1a6   : >> { %v907_v28 = vadd.f32 %v906_v4, %v833_v27  ;;  %v835_v29 = vpop.f32.mrb[3].mxu1 }
 0x1a7   : >> { %v909_v30 = vadd.f32 %v908_v6, %v835_v29 }
 0x1ab   : >> { %v839_v31 = vpop.f32.mrb[4].mxu1 }
 0x1ac   : >> { %v913_v32 = vadd.f32 %v912_v9, %v839_v31  ;;  %v841_v33 = vpop.f32.mrb[5].mxu1 }
 0x1ad   : >> { %v915_v34 = vadd.f32 %v914_v10, %v841_v33  ;;  %v843_v35 = vpop.f32.mrb[6].mxu1 }
 0x1ae   : >> { %v917_v36 = vadd.f32 %v916_v12, %v843_v35  ;;  %v845_v37 = vpop.f32.mrb[7].mxu1 }
 0x1af   : >> { %v919_v38 = vadd.f32 %v918_v14, %v845_v37  ;;  %v1930_v14 = vlaneseq }
 0x1b3   : >> { %v849_v39 = vpop.f32.mrb[8].mxu1 }
 0x1b4   : >> { %v923_v40 = vadd.f32 %v922_v15, %v849_v39  ;;  %v851_v41 = vpop.f32.mrb[9].mxu1 }
 0x1b5   : >> { %v925_v42 = vadd.f32 %v924_v16, %v851_v41  ;;  %v853_v43 = vpop.f32.mrb[10].mxu1  ;;  %v1931_v16 = vshrl.u32 %v1930_v14, 7 }
 0x1b6   : >> { %v927_v44 = vadd.f32 %v926_v17, %v853_v43  ;;  %v855_v45 = vpop.f32.mrb[11].mxu1 }
 0x1b7   : >> { %v929_v46 = vadd.f32 %v928_v18, %v855_v45  ;;  %v1936_v27 = vsub.s32 1, %v1931_v16 }
 0x1bb   : >> { %v859_v47 = vpop.f32.mrb[12].mxu1 }
 0x1bc   : >> { %v933_v48 = vadd.f32 %v932_v19, %v859_v47  ;;  %v861_v49 = vpop.f32.mrb[13].mxu1 }
 0x1bd   : >> { %v935_v50 = vadd.f32 %v934_v20, %v861_v49  ;;  %v863_v51 = vpop.f32.mrb[14].mxu1 }
 0x1be   : >> { %v937_v52 = vadd.f32 %v936_v21, %v863_v51  ;;  %v865_v53 = vpop.f32.mrb[15].mxu1 }
 0x1bf   : >> { %v939_v54 = vadd.f32 %v938_v22, %v865_v53 }
 0x1e3   : >> { %v1279_v55 = vpop.f32.mrb[16].mxu1 }
 0x1e4   : >> { %v1280_v56 = vadd.f32 %v1279_v55, %v903_v24  ;;  %v1281_v57 = vpop.f32.mrb[17].mxu1  ;;  %v1932_v24 = vsub.s32 0, %v1931_v16 }
 0x1e5   : >> { %v1282_v58 = vadd.f32 %v1281_v57, %v905_v26  ;;  %v1283_v59 = vpop.f32.mrb[18].mxu1  ;;  %v1928_v26 = vld [vmem:[%s3963_s2] sm:$0x3] }
 0x1e6   : >> { %v1284_v60 = vadd.f32 %v1283_v59, %v907_v28  ;;  %v1285_v61 = vpop.f32.mrb[19].mxu1  ;;  %v1956_v28 = vld [vmem:[%s3964_s3] sm:$0x3]  ;;  %v3820_v29 = vrot.slane %v1928_v26, %v1932_v24  ;;  %v3822_v31 = vrot.slane %v1928_v26, %v1936_v27 }
 0x1e7   : >> { %v1286_v62 = vadd.f32 %v1285_v61, %v909_v30  ;;  %v3824_v33 = vrot.slane %v1956_v28, %v1932_v24 }
 0x1eb   : >> { %v1289_v63 = vpop.f32.mrb[20].mxu1 }
 0x1ec   : >> { %v1290_v2 = vadd.f32 %v1289_v63, %v913_v32  ;;  %v1291_v0 = vpop.f32.mrb[21].mxu1 }
 0x1ed   : >> { %v1292_v1 = vadd.f32 %v1291_v0, %v915_v34  ;;  %v1293_v3 = vpop.f32.mrb[22].mxu1 }
 0x1ee   : >> { %v1294_v4 = vadd.f32 %v1293_v3, %v917_v36  ;;  %v1295_v5 = vpop.f32.mrb[23].mxu1  ;;  %v3826_v36 = vrot.slane %v1956_v28, %v1936_v27 }
 0x1ef   : >> { %v1296_v6 = vadd.f32 %v1295_v5, %v919_v38 }
 0x1f3   : >> { %v1299_v7 = vpop.f32.mrb[24].mxu1 }
 0x1f4   : >> { %v3798_v8 = vadd.f32 %v1299_v7, %v923_v40  ;;  %v1301_v9 = vpop.f32.mrb[25].mxu1 }
 0x1f5   : >> { %v3800_v10 = vadd.f32 %v1301_v9, %v925_v42  ;;  %v1303_v11 = vpop.f32.mrb[26].mxu1 }
 0x1f6   : >> { %v3802_v12 = vadd.f32 %v1303_v11, %v927_v44  ;;  %v1305_v13 = vpop.f32.mrb[27].mxu1 }
 0x1f7   : >> { %v3804_v15 = vadd.f32 %v1305_v13, %v929_v46 }
 0x1fb   : >> { %v1309_v17 = vpop.f32.mrb[28].mxu1 }
 0x1fc   : >> { %v3806_v18 = vadd.f32 %v1309_v17, %v933_v48  ;;  %v1311_v19 = vpop.f32.mrb[29].mxu1 }
 0x1fd   : >> { %v3808_v20 = vadd.f32 %v1311_v19, %v935_v50  ;;  %v1313_v21 = vpop.f32.mrb[30].mxu1 }
 0x1fe   : >> { %v3810_v22 = vadd.f32 %v1313_v21, %v937_v52  ;;  %v1315_v23 = vpop.f32.mrb[31].mxu1 }
 0x1ff   : >> { %v3812_v25 = vadd.f32 %v1315_v23, %v939_v54 }
 0x204   : >> { %v1873_v30 = vpop.f32.mrb[16].mxu0 }
 0x205   : >> { %v2715_v32 = vadd.f32 %v1873_v30, %v1280_v56  ;;  %v1875_v34 = vpop.f32.mrb[17].mxu0 }
 0x206   : >> { %v2718_v35 = vadd.f32 %v1875_v34, %v1282_v58  ;;  %v1877_v37 = vpop.f32.mrb[18].mxu0 }
 0x207   : >> { %v1940_v38 = vmul.f32 %v2715_v32, %v3820_v29  ;;  %v2721_v39 = vadd.f32 %v1877_v37, %v1284_v60  ;;  %v1879_v40 = vpop.f32.mrb[19].mxu0 }
 0x208   : >> { %v1941_v41 = vmul.f32 %v2718_v35, %v3822_v31  ;;  %v2724_v42 = vadd.f32 %v1879_v40, %v1286_v62 }
 0x209   : >> { %v1968_v43 = vadd.f32 %v3824_v33, %v1940_v38  ;;  %v1942_v44 = vmul.f32 %v2721_v39, %v3820_v29 }
 0x20a   : >> { %v1969_v45 = vadd.f32 %v3826_v36, %v1941_v41  ;;  %v1943_v46 = vmul.f32 %v2724_v42, %v3822_v31 }
 0x20b   : >> { %v1970_v47 = vadd.f32 %v3824_v33, %v1942_v44  ;;  %v1984_v50 = vmax.f32 %v1968_v43, 0.0 }
 0x20c   : >> { %v1971_v48 = vadd.f32 %v3826_v36, %v1943_v46  ;;  %v1883_v49 = vpop.f32.mrb[20].mxu0  ;;  %v1985_v54 = vmax.f32 %v1969_v45, 0.0 }
 0x20d   : >> { %v1986_v51 = vmax.f32 %v1970_v47, 0.0  ;;  %v2727_v52 = vadd.f32 %v1883_v49, %v1290_v2  ;;  %v1885_v53 = vpop.f32.mrb[21].mxu0 }
 0x20e   : >> { %v1987_v55 = vmax.f32 %v1971_v48, 0.0  ;;  %v2730_v56 = vadd.f32 %v1885_v53, %v1292_v1  ;;  %v1887_v57 = vpop.f32.mrb[22].mxu0 }
 0x20f   : >> { %v2000_v58 = vpack.c.bf16 %v1986_v51, %v1984_v50  ;;  %v1944_v59 = vmul.f32 %v2727_v52, %v3820_v29  ;;  %v2733_v60 = vadd.f32 %v1887_v57, %v1294_v4  ;;  %v1889_v61 = vpop.f32.mrb[23].mxu0 }
 0x210   : >> { %v1945_v62 = vmul.f32 %v2730_v56, %v3822_v31  ;;  %v2736_v63 = vadd.f32 %v1889_v61, %v1296_v6  ;;  %v2001_v0 = vpack.c.bf16 %v1987_v55, %v1985_v54 }
 0x211   : >> { %v1972_v3 = vadd.f32 %v3824_v33, %v1944_v59  ;;  %v1946_v5 = vmul.f32 %v2733_v60, %v3820_v29 }
 0x212   : >> { %v1973_v2 = vadd.f32 %v3826_v36, %v1945_v62  ;;  %v1947_v7 = vmul.f32 %v2736_v63, %v3822_v31  ;;  %2168 = vmatprep.mubr.bf16.mxu1 %v2001_v0 }
 0x213   : >> { %v1974_v1 = vadd.f32 %v3824_v33, %v1946_v5  ;;  %2169 = vmatmul.mubr.bf16.vlgmr.msra.gmra.mrb[32].mxu1 %v2000_v58  ;;  %v1988_v11 = vmax.f32 %v1972_v3, 0.0  ;;  %v2623_v3 = vld [vmem:[%s4005_s27] ss:$0 sm:$0xff] }
 0x214   : >> { %v1975_v9 = vadd.f32 %v3826_v36, %v1947_v7  ;;  %v1893_v4 = vpop.f32.mrb[24].mxu0  ;;  %v1989_v16 = vmax.f32 %v1973_v2, 0.0 }
 0x215   : >> { %v1990_v13 = vmax.f32 %v1974_v1, 0.0  ;;  %v2739_v6 = vadd.f32 %v1893_v4, %v3798_v8  ;;  %v1895_v14 = vpop.f32.mrb[25].mxu0 }
 0x216   : >> { %v1991_v17 = vmax.f32 %v1975_v9, 0.0  ;;  %v2742_v19 = vadd.f32 %v1895_v14, %v3800_v10  ;;  %v1897_v21 = vpop.f32.mrb[26].mxu0 }
 0x217   : >> { %v1948_v23 = vmul.f32 %v2739_v6, %v3820_v29  ;;  %v2745_v24 = vadd.f32 %v1897_v21, %v3802_v12  ;;  %v1899_v26 = vpop.f32.mrb[27].mxu0  ;;  %v2002_v27 = vpack.c.bf16 %v1990_v13, %v1988_v11 }
 0x218   : >> { %v1949_v28 = vmul.f32 %v2742_v19, %v3822_v31  ;;  %v2748_v30 = vadd.f32 %v1899_v26, %v3804_v15  ;;  %v2003_v32 = vpack.c.bf16 %v1991_v17, %v1989_v16 }
 0x219   : >> { %v1976_v34 = vadd.f32 %v3824_v33, %v1948_v23  ;;  %v1950_v8 = vmul.f32 %v2745_v24, %v3820_v29 }
 0x21a   : >> { %v1977_v35 = vadd.f32 %v3826_v36, %v1949_v28  ;;  %v1951_v10 = vmul.f32 %v2748_v30, %v3822_v31  ;;  %2176 = vmatprep.mubr.bf16.mxu1 %v2003_v32 }
 0x21b   : >> { %v1978_v37 = vadd.f32 %v3824_v33, %v1950_v8  ;;  %2177 = vmatmul.mubr.bf16.gmra.mrb[36].mxu1 %v2002_v27  ;;  %v1992_v39 = vmax.f32 %v1976_v34, 0.0 }
 0x21c   : >> { %v1979_v12 = vadd.f32 %v3826_v36, %v1951_v10  ;;  %v1903_v38 = vpop.f32.mrb[28].mxu0  ;;  %v1993_v42 = vmax.f32 %v1977_v35, 0.0 }
 0x21d   : >> { %v1994_v40 = vmax.f32 %v1978_v37, 0.0  ;;  %v2751_v15 = vadd.f32 %v1903_v38, %v3806_v18  ;;  %v1905_v41 = vpop.f32.mrb[29].mxu0 }
 0x21e   : >> { %v1995_v43 = vmax.f32 %v1979_v12, 0.0  ;;  %v2754_v44 = vadd.f32 %v1905_v41, %v3808_v20  ;;  %v1907_v45 = vpop.f32.mrb[30].mxu0 }
 0x21f   : >> { %v1952_v46 = vmul.f32 %v2751_v15, %v3820_v29  ;;  %v2757_v47 = vadd.f32 %v1907_v45, %v3810_v22  ;;  %v1909_v48 = vpop.f32.mrb[31].mxu0  ;;  %v2004_v49 = vpack.c.bf16 %v1994_v40, %v1992_v39 }
 0x220   : >> { %v1953_v50 = vmul.f32 %v2754_v44, %v3822_v31  ;;  %v2760_v51 = vadd.f32 %v1909_v48, %v3812_v25  ;;  %v2005_v52 = vpack.c.bf16 %v1995_v43, %v1993_v42 }
 0x221   : >> { %v1980_v53 = vadd.f32 %v3824_v33, %v1952_v46  ;;  %v1954_v18 = vmul.f32 %v2757_v47, %v3820_v29 }
 0x222   : >> { %v1981_v54 = vadd.f32 %v3826_v36, %v1953_v50  ;;  %v1955_v20 = vmul.f32 %v2760_v51, %v3822_v31  ;;  %2184 = vmatprep.mubr.bf16.mxu1 %v2005_v52  ;;  %v2622_v31 = vld [vmem:[%s3966_s5] ss:$0 sm:$0xff] }
 0x223   : >> { %v1982_v55 = vadd.f32 %v3824_v33, %v1954_v18  ;;  %2185 = vmatmul.mubr.bf16.gmra.mrb[40].mxu1 %v2004_v49  ;;  %v1996_v56 = vmax.f32 %v1980_v53, 0.0 }
 0x224   : >> { %v1983_v22 = vadd.f32 %v3826_v36, %v1955_v20  ;;  %v1997_v58 = vmax.f32 %v1981_v54, 0.0 }
 0x225   : >> { %v1998_v57 = vmax.f32 %v1982_v55, 0.0 }
 0x226   : >> { %v1999_v25 = vmax.f32 %v1983_v22, 0.0 }
 0x227   : >> { %v2006_v59 = vpack.c.bf16 %v1998_v57, %v1996_v56 }
 0x228   : >> { %v2007_v60 = vpack.c.bf16 %v1999_v25, %v1997_v58 }
 0x22a   : >> { %2192 = vmatprep.mubr.bf16.mxu1 %v2007_v60 }
 0x22b   : >> { %2193 = vmatmul.mubr.bf16.gmra.mrb[44].mxu1 %v2006_v59 }
 0x2e6   : >> { %v2689_v29 = vpop.f32.mrb[32].mxu1 }
 0x2e7   : >> { %v2690_v61 = vpop.f32.mrb[33].mxu1 }
 0x2e8   : >> { %v2691_v33 = vadd.f32 %v2690_v61, %v2689_v29  ;;  %v2692_v62 = vpop.f32.mrb[34].mxu1 }
 0x2e9   : >> { %v2693_v63 = vpop.f32.mrb[35].mxu1 }
 0x2ea   : >> { %v2208_v36 = vmul.f32 %v2691_v33, %v2622_v31  ;;  %v2694_v0 = vadd.f32 %v2693_v63, %v2692_v62 }
 0x2ec   : >> { %v2209_v5 = vmul.f32 %v2694_v0, %v2622_v31  ;;  %v2223_v2 = vadd.f32 %v2623_v3, %v2208_v36 }
 0x2ee   : >> { %v2224_v7 = vadd.f32 %v2623_v3, %v2209_v5  ;;  %v2695_v1 = vpop.f32.mrb[36].mxu1 }
 0x2ef   : >> { %v2696_v9 = vpop.f32.mrb[37].mxu1 }
 0x2f0   : >> { %v2653_v4 = vpack.c.bf16 %v2224_v7, %v2223_v2  ;;  %v2697_v11 = vadd.f32 %v2696_v9, %v2695_v1  ;;  %v2698_v13 = vpop.f32.mrb[38].mxu1 }
 0x2f1   : >> { %v2699_v6 = vpop.f32.mrb[39].mxu1 }
 0x2f2   : >> { %2654 = vst [vmem:[%s3878_s6] sm:$0xff] %v2653_v4   ;;  %v2210_v14 = vmul.f32 %v2697_v11, %v2622_v31  ;;  %v2700_v16 = vadd.f32 %v2699_v6, %v2698_v13 }
 0x2f4   : >> { %v2211_v17 = vmul.f32 %v2700_v16, %v2622_v31  ;;  %v2225_v19 = vadd.f32 %v2623_v3, %v2210_v14 }
 0x2f6   : >> { %v2226_v21 = vadd.f32 %v2623_v3, %v2211_v17  ;;  %v2701_v23 = vpop.f32.mrb[40].mxu1 }
 0x2f7   : >> { %v2702_v24 = vpop.f32.mrb[41].mxu1 }
 0x2f8   : >> { %v2658_v26 = vpack.c.bf16 %v2226_v21, %v2225_v19  ;;  %v2703_v27 = vadd.f32 %v2702_v24, %v2701_v23  ;;  %v2704_v28 = vpop.f32.mrb[42].mxu1 }
 0x2f9   : >> { %v2705_v30 = vpop.f32.mrb[43].mxu1 }
 0x2fa   : >> { %2670 = vst [vmem:[%s3878_s6 + $0x8] sm:$0xff] %v2658_v26   ;;  %v2212_v32 = vmul.f32 %v2703_v27, %v2622_v31  ;;  %v2706_v34 = vadd.f32 %v2705_v30, %v2704_v28 }
 0x2fc   : >> { %v2213_v8 = vmul.f32 %v2706_v34, %v2622_v31  ;;  %v2227_v35 = vadd.f32 %v2623_v3, %v2212_v32 }
 0x2fe   : >> { %v2228_v10 = vadd.f32 %v2623_v3, %v2213_v8  ;;  %v2707_v37 = vpop.f32.mrb[44].mxu1 }
 0x2ff   : >> { %v2708_v12 = vpop.f32.mrb[45].mxu1 }
 0x300   : >> { %v2663_v38 = vpack.c.bf16 %v2228_v10, %v2227_v35  ;;  %v2709_v39 = vadd.f32 %v2708_v12, %v2707_v37  ;;  %v2710_v40 = vpop.f32.mrb[46].mxu1 }
 0x301   : >> { %v2711_v15 = vpop.f32.mrb[47].mxu1 }
 0x302   : >> { %2671 = vst [vmem:[%s3878_s6 + $0x10] sm:$0xff] %v2663_v38   ;;  %v2214_v41 = vmul.f32 %v2709_v39, %v2622_v31  ;;  %v2712_v42 = vadd.f32 %v2711_v15, %v2710_v40 }
 0x304   : >> { %v2215_v43 = vmul.f32 %v2712_v42, %v2622_v31  ;;  %v2229_v44 = vadd.f32 %v2623_v3, %v2214_v41  ;;  %347 = sbr.rel (!%p345_p4) target bundleno = 143 (0x8f), region = 114 }
 0x306   : >> { %v2230_v45 = vadd.f32 %v2623_v3, %v2215_v43 }
 0x308   : >> { %v2668_v46 = vpack.c.bf16 %v2230_v45, %v2229_v44 }
 0x30a   : >> { %2672 = vst [vmem:[%s3878_s6 + $0x18] sm:$0xff] %v2668_v46  }
 0x30b   : > { %3315 = shalt.err (!%p3312_p8)
}
 0x30c   : > { %s3316_s9 = scalar_lea.hbm %s3896_s23, 1024  ;;  %s3320_s24 = scalar_lea.hbm %s4008_s15, 4096 }
 0x30d   : > { %p3317_p12 = scmp.ne.s32.totalorder %s3896_s23, %s3316_s9  ;;  %p3321_p10 = scmp.lt.u32.totalorder %s3896_s23, %s4008_s15 }
 0x30e   : > { %p3322_p0 = scmp.lt.u32.totalorder %s3320_s24, %s3316_s9  ;;  %p3324_p1 = scmp.lt.u32.totalorder %s3316_s9, %s3896_s23 }
 0x30f   : > { %p3318_p2 = pnand %p3317_p12, %p4009_p3 }
 0x310   : > { %p3323_p4 = por %p3322_p0, %p3321_p10 }
 0x311   : > { %p3319_p6 = pneg %p3318_p2 }
 0x312   : > { %p3325_p13 = por %p3324_p1, %p3323_p4 }
 0x314   : > { %p3326_p7 = pnand %p3325_p13, %p3319_p6 }
 0x316   : > { %3329 = shalt.err (!%p3326_p7)
}
 0x317   : > { %s3449_s13 = smov 64   ;;  %s3450_s16 = smov 4  }
 0x318   : > { %2806 = dma.vmem_to_hbm [thread:$0]  (%p4009_p3), %s3891_s12, 1024, %s3896_s23, %s3900_s20, %s3449_s13, %s3449_s13, %s3450_s16  }
 0x319 PF: > { %s4010_s27 = sld [smem:[#allocation12_spill]]  ;;  %s4011_s19 = sld [smem:[#allocation16_spill]] }
 0x31a   : > { %p2828_p9 = scmp.ge.s32.totalorder %s3432_s11, 2 }
 0x31f   : > { %s2306_s30 = sand.u32 1, %s4010_s27   ;;  %p4012_p11 = scmp.ne.s32.totalorder %s4011_s19, 0 }
 0x320   : > { %s2307_s8 = scalar_lea.sflag [#allocation4], %s2306_s30 }
 0x321   : > { %p2820_p5 = pnand %p2828_p9, %p4012_p11 }
 0x323   : > { %3387 = dma.done.wait (!%p2820_p5), %s2307_s8, 1024  }
 0x324   : > { %3389 = vsyncadd (!%p2820_p5), %s2307_s8, 4294966272  ;;  %s24_s11 = sadd.s32 1, %s3432_s11   ;;  %s4013_s30 = sld [smem:[#allocation14_spill]] }
 0x325   : > { %p21_p8 = scmp.ge.s32.totalorder %s24_s11, 6   ;;  %s4014_s9 = sld [smem:[#allocation17_spill]] }
 0x326   : > { %s4015_s24 = smov %s3396_s25  ;;  %s4016_s25 = smov %s3400_s26 }
 0x327   : > { %s4017_s26 = smov %s3666_s4  ;;  %s4018_s27 = smov %s3408_s28 }
 0x328   : > { %s4019_s28 = smov %s3412_s29  ;;  %s4020_s29 = smov %s3661_s18 }
 0x329   : > { %s4021_s8 = smov %s3428_s10  ;;  %s4022_s10 = smov %s4028_s7 }
 0x32a   :  { %23 = sbr.rel (!%p21_p8) target bundleno = 15 (0xf), region = 125 }
 0x331   :  { %2312 = vsyncpa [#allocation3], 1 }
 0x332   :  { %2314 = vsyncpa [#allocation3 + $0x1], 1 }
 0x333   :  { %2315 = vsyncpa [#allocation6], 1 }
 0x334   :  { %2316 = vsyncpa [#allocation4], 1 }
 0x335   :  { %2318 = vsyncpa [#allocation4 + $0x1], 1 }

</bundles_post_ra>
